<compile_context>
chip_gen: v5e
topology: v5e:2x2
jax: 0.10.0
libtpu: 0.0.40
codegen_flags: <defaults>
</compile_context>

<pallas_src>
import functools

import jax
import jax.numpy as jnp
import numpy as np
from jax.experimental import pallas as pl
from jax.experimental.pallas import tpu as pltpu

EPS = 1e-5  # PyTorch nn.LayerNorm default eps


def transition_kernel(x_ref, ln_w_ref, ln_b_ref, wab_ref, wo_ref, out_ref, *, hidden):
    # -------- fused LayerNorm (affine), statistics in f32 --------
    x = x_ref[...].astype(jnp.float32)                         # (tm, c)
    mu = jnp.mean(x, axis=-1, keepdims=True)
    var = jnp.mean((x - mu) ** 2, axis=-1, keepdims=True)
    x_ln = (x - mu) * jax.lax.rsqrt(var + EPS)
    x_ln = x_ln * ln_w_ref[...] + ln_b_ref[...]

    # -------- fused A|B projection: one wide bf16 matmul, f32 accumulation --
    ab = jnp.dot(x_ln.astype(jnp.bfloat16), wab_ref[...],
                 preferred_element_type=jnp.float32)            # (tm, 2H)
    a = ab[:, :hidden]                                          # static 128-lane split
    b = ab[:, hidden:]
    h = (a * jax.nn.sigmoid(a)) * b                             # SiLU(a) * b, f32

    # -------- output projection: bf16 operands, f32 accumulation ------------
    out = jnp.dot(h.astype(jnp.bfloat16), wo_ref[...],
                  preferred_element_type=jnp.float32)           # (tm, c)
    out_ref[...] = out.astype(out_ref.dtype)


def _round_up(x, m):
    return (x + m - 1) // m * m


def _pick_row_tile(M, c, hidden, x_itemsize, out_itemsize, vmem_limit, max_rows):
    """Largest row tile whose per-step working set fits the VMEM budget."""
    # bf16 weights (single-buffered) + LN params (f32, double-buffered).
    weight_bytes = (c * 2 * hidden + hidden * c) * 2 + 2 * 2 * c * 4
    # Conservative per-row estimate of live data inside one grid step.
    per_row = (2 * c * x_itemsize + 2 * c * out_itemsize  # x / out pipeline buffers
               + 4 * 2 * c                                # x, x_ln in f32
               + 2 * c                                    # x_ln in bf16
               + 4 * 2 * hidden                           # ab accumulator (f32)
               + 4 * hidden + 2 * hidden                  # h in f32 + bf16
               + 4 * c)                                   # out accumulator (f32)
    budget = max(vmem_limit - weight_bytes - (4 << 20), per_row * 8)
    tm = min(max_rows, budget // per_row)
    tm = max(8, (tm // 8) * 8)
    # Never larger than the (padded) problem.
    tm = min(tm, _round_up(M, 8))
    # Guarantee >= 2 grid steps so the "parallel" axis can shard across both
    # TensorCores on v7x (no-op on 1-TC parts, ~0.35us overhead otherwise).
    if M >= 16:
        tm = min(tm, _round_up(pl.cdiv(M, 2), 8))
    if M < 8:
        tm = M
    return int(tm)


def transition(x, params, *, max_block_rows=1024):
    """x: (..., c). params: ln_w (c,), ln_b (c,), wa (c, n*c), wb (c, n*c),
    wo (n*c, c) -- linear weights already transposed to (in, out)."""
    orig_shape = x.shape
    c = orig_shape[-1]
    M = int(np.prod(orig_shape[:-1]))
    x2 = x.reshape(M, c)                       # free reshape (contiguous leading dims)

    hidden = params["wa"].shape[1]
    # Weight prep (done once per call here; in a real model fold at load time):
    # fuse A|B into one wide matmul and hand the MXU bf16 operands.
    wab = jnp.concatenate([params["wa"], params["wb"]], axis=1).astype(jnp.bfloat16)
    wo = params["wo"].astype(jnp.bfloat16)
    ln_w = params["ln_w"].reshape(1, c).astype(jnp.float32)
    ln_b = params["ln_b"].reshape(1, c).astype(jnp.float32)

    try:
        vmem_cap = int(pltpu.get_tpu_info().vmem_capacity_bytes)
    except Exception:
        vmem_cap = 64 * 1024 * 1024            # conservative (v7x per-core VMEM)
    vmem_limit = int(min(vmem_cap * 3 // 4, 96 * 1024 * 1024))

    tm = _pick_row_tile(M, c, hidden, x2.dtype.itemsize, x2.dtype.itemsize,
                        vmem_limit, max_block_rows)
    grid = (pl.cdiv(M, tm),)                   # ragged last tile masked by Pallas

    def build(weight_buffers):
        def wspec(shape):
            nd = len(shape)
            idx = lambda i, _n=nd: (0,) * _n   # constant block -> weights stay resident
            if weight_buffers is None:
                return pl.BlockSpec(shape, idx)
            return pl.BlockSpec(shape, idx, pipeline_mode=pl.Buffered(weight_buffers))

        return pl.pallas_call(
            functools.partial(transition_kernel, hidden=hidden),
            out_shape=jax.ShapeDtypeStruct((M, c), x.dtype),
            grid=grid,
            in_specs=[
                pl.BlockSpec((tm, c), lambda i: (i, 0)),   # x rows, streamed
                wspec(ln_w.shape),
                wspec(ln_b.shape),
                wspec(wab.shape),
                wspec(wo.shape),
            ],
            out_specs=pl.BlockSpec((tm, c), lambda i: (i, 0)),
            compiler_params=pltpu.CompilerParams(
                dimension_semantics=("parallel",),         # rows independent -> megacore
                vmem_limit_bytes=vmem_limit,
            ),
        )

    try:
        out = build(1)(x2, ln_w, ln_b, wab, wo)            # single-buffer constant weights
    except Exception:
        # TODO(synk): fallback for jax builds that reject Buffered(1) operands.
        out = build(None)(x2, ln_w, ln_b, wab, wo)

    return out.reshape(orig_shape)


# ------------------------- pure-JAX reference (module semantics) -------------------------
def reference(x, p):
    mu = x.mean(-1, keepdims=True)
    var = ((x - mu) ** 2).mean(-1, keepdims=True)
    y = (x - mu) * jax.lax.rsqrt(var + EPS) * p["ln_w"] + p["ln_b"]
    a = y @ p["wa"]
    b = y @ p["wb"]
    return (jax.nn.silu(a) * b) @ p["wo"]


def make_params(key, c, n):
    hidden = n * c
    ks = jax.random.split(key, 5)
    rnd = lambda k, shape, s: (s * jax.random.normal(k, shape)).astype(jnp.float32)
    return {
        "ln_w": 1.0 + rnd(ks[0], (c,), 0.1),
        "ln_b": rnd(ks[1], (c,), 0.1),
        "wa": rnd(ks[2], (c, hidden), 0.05),
        "wb": rnd(ks[3], (c, hidden), 0.05),
        "wo": rnd(ks[4], (hidden, c), 0.05),
    }


if __name__ == "__main__":
    B, N, c, n = 2, 16, 128, 4   # hidden = n*c = 512, all dims lane-dense

    key = jax.random.PRNGKey(0)
    k_x, k_p = jax.random.split(key)
    x = jax.random.normal(k_x, (B, N, c), jnp.float32)
    params = make_params(k_p, c, n)

    out = transition(x, params)
    out = jax.block_until_ready(out)

    ref = jax.block_until_ready(reference(x, params))
    # Kernel uses bf16 MXU operands with f32 accumulation -> compare against the
    # full-f32 module reference with a tolerance that covers bf16 operand rounding.
    np.testing.assert_allclose(np.asarray(out), np.asarray(ref),
                               rtol=2e-2, atol=2e-2)
    print("KERNEL_OK")
</pallas_src>

<mosaic_0001>
module attributes {stable_mosaic.version = 11 : i64} {
  func.func @transition_kernel(%arg0: i32, %arg1: memref<16x128xf32, #tpu.memory_space<vmem>>, %arg2: memref<1x128xf32, #tpu.memory_space<vmem>>, %arg3: memref<1x128xf32, #tpu.memory_space<vmem>>, %arg4: memref<128x1024xbf16, #tpu.memory_space<vmem>>, %arg5: memref<512x128xbf16, #tpu.memory_space<vmem>>, %arg6: memref<16x128xf32, #tpu.memory_space<vmem>>) attributes {dimension_semantics = [#tpu.dimension_semantics<parallel>], iteration_bounds = array<i64: 2>, scalar_prefetch = 0 : i64, scratch_operands = 0 : i64, tpu.core_type = #tpu.core_type<tc>, window_params = [{transform_indices = @transform_0, window_bounds = array<i64: 16, 128>}, {pipeline_mode = #tpu.pipeline_mode<synchronous>, transform_indices = @transform_1, window_bounds = array<i64: 1, 128>}, {pipeline_mode = #tpu.pipeline_mode<synchronous>, transform_indices = @transform_2, window_bounds = array<i64: 1, 128>}, {pipeline_mode = #tpu.pipeline_mode<synchronous>, transform_indices = @transform_3, window_bounds = array<i64: 128, 1024>}, {pipeline_mode = #tpu.pipeline_mode<synchronous>, transform_indices = @transform_4, window_bounds = array<i64: 512, 128>}, {transform_indices = @transform_5, window_bounds = array<i64: 16, 128>}]} {
    %c0 = arith.constant 0 : index
    %c0_0 = arith.constant 0 : index
    %0 = vector.load %arg1[%c0, %c0_0] : memref<16x128xf32, #tpu.memory_space<vmem>>, vector<16x128xf32>
    %cst = arith.constant dense<0.000000e+00> : vector<16xf32>
    %1 = vector.multi_reduction <add>, %0, %cst [1] : vector<16x128xf32> to vector<16xf32>
    %2 = vector.shape_cast %1 : vector<16xf32> to vector<16x1xf32>
    %cst_1 = arith.constant 1.280000e+02 : f32
    %3 = vector.broadcast %cst_1 : f32 to vector<16x1xf32>
    %4 = arith.divf %2, %3 : vector<16x1xf32>
    %5 = vector.broadcast %4 : vector<16x1xf32> to vector<16x128xf32>
    %6 = arith.subf %0, %5 : vector<16x128xf32>
    %7 = arith.mulf %6, %6 : vector<16x128xf32>
    %cst_2 = arith.constant dense<0.000000e+00> : vector<16xf32>
    %8 = vector.multi_reduction <add>, %7, %cst_2 [1] : vector<16x128xf32> to vector<16xf32>
    %9 = vector.shape_cast %8 : vector<16xf32> to vector<16x1xf32>
    %cst_3 = arith.constant 1.280000e+02 : f32
    %10 = vector.broadcast %cst_3 : f32 to vector<16x1xf32>
    %11 = arith.divf %9, %10 : vector<16x1xf32>
    %12 = vector.broadcast %4 : vector<16x1xf32> to vector<16x128xf32>
    %13 = arith.subf %0, %12 : vector<16x128xf32>
    %cst_4 = arith.constant 9.99999974E-6 : f32
    %14 = vector.broadcast %cst_4 : f32 to vector<16x1xf32>
    %15 = arith.addf %11, %14 : vector<16x1xf32>
    %16 = math.rsqrt %15 : vector<16x1xf32>
    %17 = vector.broadcast %16 : vector<16x1xf32> to vector<16x128xf32>
    %18 = arith.mulf %13, %17 : vector<16x128xf32>
    %c0_5 = arith.constant 0 : index
    %c0_6 = arith.constant 0 : index
    %19 = vector.load %arg2[%c0_5, %c0_6] : memref<1x128xf32, #tpu.memory_space<vmem>>, vector<1x128xf32>
    %20 = vector.broadcast %19 : vector<1x128xf32> to vector<16x128xf32>
    %21 = arith.mulf %18, %20 : vector<16x128xf32>
    %c0_7 = arith.constant 0 : index
    %c0_8 = arith.constant 0 : index
    %22 = vector.load %arg3[%c0_7, %c0_8] : memref<1x128xf32, #tpu.memory_space<vmem>>, vector<1x128xf32>
    %23 = vector.broadcast %22 : vector<1x128xf32> to vector<16x128xf32>
    %24 = arith.addf %21, %23 : vector<16x128xf32>
    %25 = arith.truncf %24 : vector<16x128xf32> to vector<16x128xbf16>
    %c0_9 = arith.constant 0 : index
    %c0_10 = arith.constant 0 : index
    %26 = vector.load %arg4[%c0_9, %c0_10] : memref<128x1024xbf16, #tpu.memory_space<vmem>>, vector<128x1024xbf16>
    %cst_11 = arith.constant dense<0.000000e+00> : vector<16x1024xf32>
    %27 = tpu.matmul %25, %26, %cst_11 {dimension_numbers = #tpu.dot_dimension_numbers<[1], [0], [0], [1], [0, 0, 1, 1], [], []>} : vector<16x128xbf16>, vector<128x1024xbf16>, vector<16x1024xf32> -> vector<16x1024xf32>
    %28 = vector.extract_strided_slice %27 {offsets = [0, 0], sizes = [16, 512], strides = [1, 1]} : vector<16x1024xf32> to vector<16x512xf32>
    %29 = vector.extract_strided_slice %27 {offsets = [0, 512], sizes = [16, 512], strides = [1, 1]} : vector<16x1024xf32> to vector<16x512xf32>
    %30 = arith.negf %28 : vector<16x512xf32>
    %31 = math.exp %30 : vector<16x512xf32>
    %cst_12 = arith.constant 1.000000e+00 : f32
    %32 = vector.broadcast %cst_12 : f32 to vector<16x512xf32>
    %33 = arith.addf %32, %31 : vector<16x512xf32>
    %34 = arith.divf %32, %33 : vector<16x512xf32>
    %35 = arith.mulf %28, %34 : vector<16x512xf32>
    %36 = arith.mulf %35, %29 : vector<16x512xf32>
    %37 = arith.truncf %36 : vector<16x512xf32> to vector<16x512xbf16>
    %c0_13 = arith.constant 0 : index
    %c0_14 = arith.constant 0 : index
    %38 = vector.load %arg5[%c0_13, %c0_14] : memref<512x128xbf16, #tpu.memory_space<vmem>>, vector<512x128xbf16>
    %cst_15 = arith.constant dense<0.000000e+00> : vector<16x128xf32>
    %39 = tpu.matmul %37, %38, %cst_15 {dimension_numbers = #tpu.dot_dimension_numbers<[1], [0], [0], [1], [0, 0, 1, 1], [], []>} : vector<16x512xbf16>, vector<512x128xbf16>, vector<16x128xf32> -> vector<16x128xf32>
    %c0_16 = arith.constant 0 : index
    %c0_17 = arith.constant 0 : index
    %40 = vector.load %arg6[%c0_16, %c0_17] : memref<16x128xf32, #tpu.memory_space<vmem>>, vector<16x128xf32>
    tpu.vector_store %arg6[%c0_16, %c0_17], %39 {strides = array<i32>} : memref<16x128xf32, #tpu.memory_space<vmem>>, vector<16x128xf32>,
    return
  }
  func.func @transform_0(%arg0: i32) -> (i32, i32) {
    %c0_i32 = arith.constant 0 : i32
    %c0_i32_0 = arith.constant 0 : i32
    return %arg0, %c0_i32 : i32, i32
  }
  func.func @transform_1(%arg0: i32) -> (i32, i32) {
    %c0_i32 = arith.constant 0 : i32
    %c0_i32_0 = arith.constant 0 : i32
    %c0_i32_1 = arith.constant 0 : i32
    return %c0_i32, %c0_i32_0 : i32, i32
  }
  func.func @transform_2(%arg0: i32) -> (i32, i32) {
    %c0_i32 = arith.constant 0 : i32
    %c0_i32_0 = arith.constant 0 : i32
    %c0_i32_1 = arith.constant 0 : i32
    return %c0_i32, %c0_i32_0 : i32, i32
  }
  func.func @transform_3(%arg0: i32) -> (i32, i32) {
    %c0_i32 = arith.constant 0 : i32
    %c0_i32_0 = arith.constant 0 : i32
    %c0_i32_1 = arith.constant 0 : i32
    return %c0_i32, %c0_i32_0 : i32, i32
  }
  func.func @transform_4(%arg0: i32) -> (i32, i32) {
    %c0_i32 = arith.constant 0 : i32
    %c0_i32_0 = arith.constant 0 : i32
    %c0_i32_1 = arith.constant 0 : i32
    return %c0_i32, %c0_i32_0 : i32, i32
  }
  func.func @transform_5(%arg0: i32) -> (i32, i32) {
    %c0_i32 = arith.constant 0 : i32
    %c0_i32_0 = arith.constant 0 : i32
    return %arg0, %c0_i32 : i32, i32
  }
}

module attributes {stable_mosaic.version = 11 : i64} {
  func.func @transition_kernel(%arg0: i32, %arg1: memref<16x128xf32, #tpu.memory_space<vmem>>, %arg2: memref<1x128xf32, #tpu.memory_space<vmem>>, %arg3: memref<1x128xf32, #tpu.memory_space<vmem>>, %arg4: memref<128x1024xbf16, #tpu.memory_space<vmem>>, %arg5: memref<512x128xbf16, #tpu.memory_space<vmem>>, %arg6: memref<16x128xf32, #tpu.memory_space<vmem>>) attributes {dimension_semantics = [#tpu.dimension_semantics<parallel>], iteration_bounds = array<i64: 2>, scalar_prefetch = 0 : i64, scratch_operands = 0 : i64, tpu.core_type = #tpu.core_type<tc>, window_params = [{transform_indices = @transform_0, window_bounds = array<i64: 16, 128>}, {pipeline_mode = #tpu.pipeline_mode<synchronous>, transform_indices = @transform_1, window_bounds = array<i64: 1, 128>}, {pipeline_mode = #tpu.pipeline_mode<synchronous>, transform_indices = @transform_2, window_bounds = array<i64: 1, 128>}, {pipeline_mode = #tpu.pipeline_mode<synchronous>, transform_indices = @transform_3, window_bounds = array<i64: 128, 1024>}, {pipeline_mode = #tpu.pipeline_mode<synchronous>, transform_indices = @transform_4, window_bounds = array<i64: 512, 128>}, {transform_indices = @transform_5, window_bounds = array<i64: 16, 128>}]} {
    %c0 = arith.constant 0 : index
    %c0_0 = arith.constant 0 : index
    %0 = vector.load %arg1[%c0, %c0_0] : memref<16x128xf32, #tpu.memory_space<vmem>>, vector<16x128xf32>
    %cst = arith.constant dense<0.000000e+00> : vector<16xf32>
    %1 = vector.multi_reduction <add>, %0, %cst [1] : vector<16x128xf32> to vector<16xf32>
    %2 = vector.shape_cast %1 : vector<16xf32> to vector<16x1xf32>
    %cst_1 = arith.constant 1.280000e+02 : f32
    %3 = vector.broadcast %cst_1 : f32 to vector<16x1xf32>
    %4 = arith.divf %2, %3 : vector<16x1xf32>
    %5 = vector.broadcast %4 : vector<16x1xf32> to vector<16x128xf32>
    %6 = arith.subf %0, %5 : vector<16x128xf32>
    %7 = arith.mulf %6, %6 : vector<16x128xf32>
    %cst_2 = arith.constant dense<0.000000e+00> : vector<16xf32>
    %8 = vector.multi_reduction <add>, %7, %cst_2 [1] : vector<16x128xf32> to vector<16xf32>
    %9 = vector.shape_cast %8 : vector<16xf32> to vector<16x1xf32>
    %cst_3 = arith.constant 1.280000e+02 : f32
    %10 = vector.broadcast %cst_3 : f32 to vector<16x1xf32>
    %11 = arith.divf %9, %10 : vector<16x1xf32>
    %12 = vector.broadcast %4 : vector<16x1xf32> to vector<16x128xf32>
    %13 = arith.subf %0, %12 : vector<16x128xf32>
    %cst_4 = arith.constant 9.99999974E-6 : f32
    %14 = vector.broadcast %cst_4 : f32 to vector<16x1xf32>
    %15 = arith.addf %11, %14 : vector<16x1xf32>
    %16 = math.rsqrt %15 : vector<16x1xf32>
    %17 = vector.broadcast %16 : vector<16x1xf32> to vector<16x128xf32>
    %18 = arith.mulf %13, %17 : vector<16x128xf32>
    %c0_5 = arith.constant 0 : index
    %c0_6 = arith.constant 0 : index
    %19 = vector.load %arg2[%c0_5, %c0_6] : memref<1x128xf32, #tpu.memory_space<vmem>>, vector<1x128xf32>
    %20 = vector.broadcast %19 : vector<1x128xf32> to vector<16x128xf32>
    %21 = arith.mulf %18, %20 : vector<16x128xf32>
    %c0_7 = arith.constant 0 : index
    %c0_8 = arith.constant 0 : index
    %22 = vector.load %arg3[%c0_7, %c0_8] : memref<1x128xf32, #tpu.memory_space<vmem>>, vector<1x128xf32>
    %23 = vector.broadcast %22 : vector<1x128xf32> to vector<16x128xf32>
    %24 = arith.addf %21, %23 : vector<16x128xf32>
    %25 = arith.truncf %24 : vector<16x128xf32> to vector<16x128xbf16>
    %c0_9 = arith.constant 0 : index
    %c0_10 = arith.constant 0 : index
    %26 = vector.load %arg4[%c0_9, %c0_10] : memref<128x1024xbf16, #tpu.memory_space<vmem>>, vector<128x1024xbf16>
    %cst_11 = arith.constant dense<0.000000e+00> : vector<16x1024xf32>
    %27 = tpu.matmul %25, %26, %cst_11 {dimension_numbers = #tpu.dot_dimension_numbers<[1], [0], [0], [1], [0, 0, 1, 1], [], []>} : vector<16x128xbf16>, vector<128x1024xbf16>, vector<16x1024xf32> -> vector<16x1024xf32>
    %28 = vector.extract_strided_slice %27 {offsets = [0, 0], sizes = [16, 512], strides = [1, 1]} : vector<16x1024xf32> to vector<16x512xf32>
    %29 = vector.extract_strided_slice %27 {offsets = [0, 512], sizes = [16, 512], strides = [1, 1]} : vector<16x1024xf32> to vector<16x512xf32>
    %30 = arith.negf %28 : vector<16x512xf32>
    %31 = math.exp %30 : vector<16x512xf32>
    %cst_12 = arith.constant 1.000000e+00 : f32
    %32 = vector.broadcast %cst_12 : f32 to vector<16x512xf32>
    %33 = arith.addf %32, %31 : vector<16x512xf32>
    %34 = arith.divf %32, %33 : vector<16x512xf32>
    %35 = arith.mulf %28, %34 : vector<16x512xf32>
    %36 = arith.mulf %35, %29 : vector<16x512xf32>
    %37 = arith.truncf %36 : vector<16x512xf32> to vector<16x512xbf16>
    %c0_13 = arith.constant 0 : index
    %c0_14 = arith.constant 0 : index
    %38 = vector.load %arg5[%c0_13, %c0_14] : memref<512x128xbf16, #tpu.memory_space<vmem>>, vector<512x128xbf16>
    %cst_15 = arith.constant dense<0.000000e+00> : vector<16x128xf32>
    %39 = tpu.matmul %37, %38, %cst_15 {dimension_numbers = #tpu.dot_dimension_numbers<[1], [0], [0], [1], [0, 0, 1, 1], [], []>} : vector<16x512xbf16>, vector<512x128xbf16>, vector<16x128xf32> -> vector<16x128xf32>
    %c0_16 = arith.constant 0 : index
    %c0_17 = arith.constant 0 : index
    %40 = vector.load %arg6[%c0_16, %c0_17] : memref<16x128xf32, #tpu.memory_space<vmem>>, vector<16x128xf32>
    tpu.vector_store %arg6[%c0_16, %c0_17], %39 {strides = array<i32>} : memref<16x128xf32, #tpu.memory_space<vmem>>, vector<16x128xf32>,
    return
  }
  func.func @transform_0(%arg0: i32) -> (i32, i32) {
    %c0_i32 = arith.constant 0 : i32
    %c0_i32_0 = arith.constant 0 : i32
    return %arg0, %c0_i32 : i32, i32
  }
  func.func @transform_1(%arg0: i32) -> (i32, i32) {
    %c0_i32 = arith.constant 0 : i32
    %c0_i32_0 = arith.constant 0 : i32
    %c0_i32_1 = arith.constant 0 : i32
    return %c0_i32, %c0_i32_0 : i32, i32
  }
  func.func @transform_2(%arg0: i32) -> (i32, i32) {
    %c0_i32 = arith.constant 0 : i32
    %c0_i32_0 = arith.constant 0 : i32
    %c0_i32_1 = arith.constant 0 : i32
    return %c0_i32, %c0_i32_0 : i32, i32
  }
  func.func @transform_3(%arg0: i32) -> (i32, i32) {
    %c0_i32 = arith.constant 0 : i32
    %c0_i32_0 = arith.constant 0 : i32
    %c0_i32_1 = arith.constant 0 : i32
    return %c0_i32, %c0_i32_0 : i32, i32
  }
  func.func @transform_4(%arg0: i32) -> (i32, i32) {
    %c0_i32 = arith.constant 0 : i32
    %c0_i32_0 = arith.constant 0 : i32
    %c0_i32_1 = arith.constant 0 : i32
    return %c0_i32, %c0_i32_0 : i32, i32
  }
  func.func @transform_5(%arg0: i32) -> (i32, i32) {
    %c0_i32 = arith.constant 0 : i32
    %c0_i32_0 = arith.constant 0 : i32
    return %arg0, %c0_i32 : i32, i32
  }
}

</mosaic_0001>

<bundles_post_ra>
// kernel: tpu_custom_call.1
= control target key start
LH: loop header
LB: loop body
LE: loop exit
PB: predicated region body
PF: predicated region fallthrough
CT: control target
= control target key end

     0   :  { %10 = vsyncpa [#allocation3], 0  ;;  %s2712_s0 = inlined_call_operand.hbm [shape: f32[32,128], index: 0, kind: input, shape index: {}]   ;;  %s2713_s1 = inlined_call_operand.hbm [shape: f32[1,128], index: 1, kind: input, shape index: {}]   ;;  %s2714_s2 = inlined_call_operand.vmem [shape: f32[1,128], index: 2, kind: input, shape index: {}]   ;;  %s2715_s3 = inlined_call_operand.hbm [shape: bf16[128,1024], index: 3, kind: input, shape index: {}]   ;;  %s2716_s4 = inlined_call_operand.hbm [shape: bf16[512,128], index: 4, kind: input, shape index: {}]   ;;  %s2717_s5 = inlined_call_operand.hbm [shape: f32[32,128], index: 5, kind: output, shape index: {}]  }
   0x1   :  { %12 = vsyncpa [#allocation3 + $0x1], 0 }
   0x2   :  { %13 = vsyncpa [#allocation6], 0 }
   0x3   :  { %14 = vsyncpa [#allocation9], 0 }
   0x4   :  { %15 = vsyncpa [#allocation4], 0 }
   0x5   :  { %17 = vsyncpa [#allocation4 + $0x1], 0  ;;  %s2331_s18 = smov 0   ;;  %s2333_s19 = smov 0  }
   0x6   :  { %s2335_s20 = smov 0   ;;  %s2337_s21 = smov 0  }
   0x7 LB: > { %s2352_s22 = sadd.s32 4294967295, %s2287_s21   ;;  %s1457_s23 = sadd.s32 4294967294, %s2287_s21   ;;  %s2287_s21 = sphi %s2337_s21, %s2748_s21   ;;  %s2283_s20 = sphi %s2335_s20, %s2747_s20   ;;  %s2279_s19 = sphi %s2333_s19, %s2746_s19   ;;  %s2275_s18 = sphi %s2331_s18, %s2745_s18  }
   0x8   : > { %p43_p0 = scmp.ne.s32.totalorder %s2279_s19, %s2275_s18  ;;  %p44_p1 = scmp.eq.s32.totalorder %s2352_s22, 0 }
   0x9   : > { %p151_p2 = scmp.eq.s32.totalorder %s2352_s22, 1  ;;  %p157_p3 = scmp.eq.s32.totalorder %s1457_s23, 1 }
   0xa   : > { %p2361_p4 = por %p44_p1, %p43_p0  ;;  %p1458_p5 = scmp.ge.s32.totalorder %s2287_s21, 1 }
   0xb   : > { %p2366_p6 = por %p157_p3, %p43_p0  ;;  %p164_p7 = scmp.lt.s32.totalorder %s2287_s21, 3 }
   0xc   : > { %s176_s28 = sshll.u32 %s2713_s1, 4  ;;  %s2289_s30 = smov [#allocation5]   ;;  %s177_s28 = int_to_ptr.hbm [resolvable:$true] %s176_s28 }
   0xd   : > { %p2374_p8 = pnand %p1458_p5, %p164_p7  ;;  %s178_s6 = sshll.u32 %s2289_s30, 4  ;;  %s179_s6 = int_to_ptr.vmem [resolvable:$true] %s178_s6 }
   0xe   : > { %s190_s9 = sshll.u32 %s2715_s3, 4  ;;  %s2290_s11 = smov [#allocation7]   ;;  %s191_s9 = int_to_ptr.hbm [resolvable:$true] %s190_s9 }
   0xf   : > { %p1983_p10 = pneg %p2374_p8  ;;  %s192_s12 = sshll.u32 %s2290_s11, 4  ;;  %s193_s12 = int_to_ptr.vmem [resolvable:$true] %s192_s12 }
  0x10   : > { %s2291_s13 = smov 512   ;;  %s2292_s14 = smov 32  }
  0x11   : > { %p2386_p11 = pnand %p1983_p10, %p44_p1  ;;  %s204_s17 = sshll.u32 %s2716_s4, 4  ;;  %s205_s17 = int_to_ptr.hbm [resolvable:$true] %s204_s17 }
  0x12   : > { %s2293_s23 = smov [#allocation8]   ;;  %s2294_s27 = smov 64  }
  0x13   : > { %1986 = dma.hbm_to_vmem [thread:$0]  (!%p2386_p11), %s177_s28, 16, %s179_s6, [#allocation6]  }
  0x14   : > { %1989 = dma.hbm_to_vmem [thread:$0]  (!%p2386_p11), %s191_s9, 8192, %s193_s12, [#allocation6], %s2291_s13, %s2291_s13, %s2292_s14  }
  0x15   : > { %s206_s26 = sshll.u32 %s2293_s23, 4  ;;  %s2295_s28 = smov 4   ;;  %s207_s26 = int_to_ptr.vmem [resolvable:$true] %s206_s26 }
  0x16   : > { %1992 = dma.hbm_to_vmem [thread:$0]  (!%p2386_p11), %s205_s17, 4096, %s207_s26, [#allocation9], %s2294_s27, %s2294_s27, %s2295_s28  }
  0x17   : > { %s2400_s30 = sadd.s32 1, %s2287_s21   ;;  %s30_s7 = sadd.s32 1, %s2283_s20 }
  0x18   : > { %s27_s6 = ssub.s32 %s2287_s21, %s2400_s30  ;;  %p37_p13 = scmp.ne.s32.totalorder %s2283_s20, %s2279_s19 }
  0x19   : > { %p28_p12 = scmp.eq.s32.totalorder %s27_s6, 0  ;;  %p38_p0 = scmp.eq.s32.totalorder %s2287_s21, 0 }
  0x1a   : > { %p2004_p3 = scmp.lt.s32.totalorder %s2287_s21, 2  ;;  %p2414_p7 = por %p151_p2, %p37_p13 }
  0x1b   : > { %s2410_s8 = scalar_select %p28_p12, %s2283_s20, %s30_s7  }
  0x1c   : > { %p39_p5 = por %p38_p0, %p37_p13  ;;  %s220_s10 = sand.u32 1, %s2283_s20  }
  0x1d   : > { %s1869_s11 = sshll.u32 %s2287_s21, 4  ;;  %s1463_s12 = sshll.u32 %s220_s10, 4 }
  0x1e   : > { %s229_s15 = scalar_lea.hbm %s2712_s0, %s1869_s11  ;;  %s224_s17 = scalar_lea.vmem [#allocation2], %s1463_s12 }
  0x1f   : > { %s230_s16 = sshll.u32 %s229_s15, 4  ;;  %s232_s23 = sshll.u32 %s224_s17, 4  ;;  %s231_s16 = int_to_ptr.hbm [resolvable:$true] %s230_s16  ;;  %s233_s23 = int_to_ptr.vmem [resolvable:$true] %s232_s23 }
  0x20   : > { %p2425_p10 = pnand %p2004_p3, %p39_p5  ;;  %s221_s27 = scalar_lea.sflag [#allocation3], %s220_s10 }
  0x21   : > { %s2183_s28 = sshra.s32 %s231_s16, 4  ;;  %s2190_s12 = scalar_lea.hbm %s2712_s0, 32  ;;  %s2184_s28 = int_to_ptr.hbm [resolvable:$true] %s2183_s28 }
  0x22   : > { %s2185_s6 = scalar_lea.hbm %s2184_s28, 16  ;;  %p2187_p11 = pneg %p2425_p10 }
  0x23   : > { %p2186_p2 = scmp.ne.s32.totalorder %s2184_s28, %s2185_s6  ;;  %p2191_p0 = scmp.lt.s32.totalorder %s2184_s28, %s2712_s0 }
  0x24   : > { %p2192_p3 = scmp.lt.s32.totalorder %s2190_s12, %s2185_s6 }
  0x25   : > { %p2188_p12 = pnand %p2187_p11, %p2186_p2 }
  0x26   : > { %p2193_p5 = por %p2192_p3, %p2191_p0 }
  0x27   : > { %p2189_p13 = pneg %p2188_p12 }
  0x29   : > { %p2194_p9 = pnand %p2193_p5, %p2189_p13 }
  0x2b   : > { %2197 = shalt.err (!%p2194_p9)
}
  0x2c   : > { %s2296_s10 = smov 128   ;;  %s2297_s15 = smov 8  }
  0x2d   : > { %1996 = dma.hbm_to_vmem [thread:$0]  (!%p2425_p10), %s231_s16, 256, %s233_s23, %s221_s27, %s2296_s10, %s2296_s10, %s2297_s15  }
  0x2e   : > { %244 = sbr.rel (%p2374_p8) target bundleno = 659 (0x293), region = 40  ;;  %s2442_s17 = sand.u32 (!%p2374_p8), 1, %s2279_s19  }
  0x2f   : > { %s1467_s28 = sshll.u32 (!%p2374_p8), %s2442_s17, 4  ;;  %s247_s6 = scalar_lea.sflag (!%p2374_p8), [#allocation3], %s2442_s17 }
  0x30   : > { %s250_s7 = scalar_lea.vmem (!%p2374_p8), [#allocation2], %s1467_s28 }
  0x33   : > { %2258 = dma.done.wait (%p2361_p4), %s247_s6, 256  }
  0x34   : > { %2260 = vsyncadd (%p2361_p4), %s247_s6, 4294967040 }
  0x35   : > { %2262 = dma.done.wait (%p44_p1), [#allocation6], 8208  }
  0x36   : > { %2264 = vsyncadd (%p44_p1), [#allocation6], 4294959088 }
  0x37   : > { %2266 = dma.done.wait (%p44_p1), [#allocation9], 4096  }
  0x38   : > { %2268 = vsyncadd (%p44_p1), [#allocation9], 4294963200  ;;  %v295_v0 = vld [vmem:[%s250_s7] sm:$0xff]  ;;  %v296_v1 = vld [vmem:[%s250_s7 + $0x8] sm:$0xff]  ;;  %v2298_v2 = vmov 128.0   ;;  %s1966_s16 = sshll.u32 %s2352_s22, 4 }
  0x39   : > { %297 = vadd.xlane.f32.xlu0 %v295_v0  ;;  %2055 = vrcp.f32 %v2298_v2  ;;  %v1698_v6 = vld [vmem:[#allocation7 + $0x1c0] sm:$0xf]  ;;  %v1926_v8 = vld [vmem:[#allocation7 + $0x1c4] sm:$0xf]  ;;  %v1706_v11 = vld [vmem:[#allocation7 + $0x1c8] sm:$0xf]  ;;  %s1351_s11 = scalar_lea.hbm %s2717_s5, %s1966_s16 }
  0x3a   : > { %v1930_v7 = vld [vmem:[#allocation7 + $0x1dc] sm:$0xf0]  ;;  %v1700_v10 = vld [vmem:[#allocation7 + $0x1e0] sm:$0xf0]  ;;  %v1931_v12 = vld [vmem:[#allocation7 + $0x1e4] sm:$0xf0] }
  0x3b   : > { %v1699_v9 = vor.u32 %v1930_v7, %v1698_v6  ;;  %v1703_v13 = vor.u32 %v1926_v8, %v1700_v10  ;;  %v1707_v14 = vor.u32 %v1931_v12, %v1706_v11  ;;  %v1927_v15 = vld [vmem:[#allocation7 + $0x1cc] sm:$0xf]  ;;  %v1666_v17 = vld [vmem:[#allocation7 + $0x180] sm:$0xf]  ;;  %v1918_v20 = vld [vmem:[#allocation7 + $0x184] sm:$0xf] }
  0x3c   : > { %v1708_v16 = vld [vmem:[#allocation7 + $0x1e8] sm:$0xf0]  ;;  %v1922_v19 = vld [vmem:[#allocation7 + $0x19c] sm:$0xf0]  ;;  %v1668_v21 = vld [vmem:[#allocation7 + $0x1a0] sm:$0xf0] }
  0x3d   : > { %741 = vmatpush.bf16.msra.mxu0 %v1699_v9  ;;  %v1711_v18 = vor.u32 %v1927_v15, %v1708_v16  ;;  %755 = vmatpush.bf16.msra.mxu1 %v1703_v13  ;;  %v1667_v22 = vor.u32 %v1922_v19, %v1666_v17  ;;  %v1671_v23 = vor.u32 %v1918_v20, %v1668_v21  ;;  %v1674_v24 = vld [vmem:[#allocation7 + $0x188] sm:$0xf]  ;;  %v1919_v26 = vld [vmem:[#allocation7 + $0x18c] sm:$0xf]  ;;  %v1634_v41 = vld [vmem:[#allocation7 + $0x140] sm:$0xf] }
  0x3e   : > { %769 = vmatpush.bf16.msra.mxu2 %v1707_v14  ;;  %v1923_v25 = vld [vmem:[#allocation7 + $0x1a4] sm:$0xf0]  ;;  %v1676_v28 = vld [vmem:[#allocation7 + $0x1a8] sm:$0xf0]  ;;  %v1914_v42 = vld [vmem:[#allocation7 + $0x15c] sm:$0xf0] }
  0x3f   : > { %v2056_v3 = vpop.eup %2055  ;;  %783 = vmatpush.bf16.msra.mxu3 %v1711_v18  ;;  %v1675_v27 = vor.u32 %v1923_v25, %v1674_v24  ;;  %v1679_v29 = vor.u32 %v1919_v26, %v1676_v28  ;;  %v1910_v43 = vld [vmem:[#allocation7 + $0x144] sm:$0xf]  ;;  %v1635_v44 = vor.u32 %v1914_v42, %v1634_v41  ;;  %v1642_v46 = vld [vmem:[#allocation7 + $0x148] sm:$0xf]  ;;  %v1911_v50 = vld [vmem:[#allocation7 + $0x14c] sm:$0xf] }
  0x40   : > { %v302_v4 = vmul.f32 128.0, %v2056_v3  ;;  %vm306_vm0 = vweird.f32 %v2056_v3  ;;  %v1636_v45 = vld [vmem:[#allocation7 + $0x160] sm:$0xf0]  ;;  %v1915_v47 = vld [vmem:[#allocation7 + $0x164] sm:$0xf0]  ;;  %s292_s23 = scalar_lea.vmem [#allocation10], %s1467_s28 }
  0x41   : > { %299 = vadd.xlane.f32.xlu0 %v296_v1  ;;  %742 = vmatpush.bf16.msra.mxu0 %v1667_v22  ;;  %v1639_v48 = vor.u32 %v1910_v43, %v1636_v45  ;;  %v1643_v49 = vor.u32 %v1915_v47, %v1642_v46  ;;  %v1644_v51 = vld [vmem:[#allocation7 + $0x168] sm:$0xf0]  ;;  %v1602_v53 = vld [vmem:[#allocation7 + $0x100] sm:$0xf]  ;;  %v1902_v55 = vld [vmem:[#allocation7 + $0x104] sm:$0xf] }
  0x42   : > { %v303_v5 = vsub.f32 1.0, %v302_v4  ;;  %756 = vmatpush.bf16.msra.mxu1 %v1671_v23  ;;  %770 = vmatpush.bf16.msra.mxu2 %v1675_v27  ;;  %v1647_v52 = vor.u32 %v1911_v50, %v1644_v51  ;;  %v1906_v54 = vld [vmem:[#allocation7 + $0x11c] sm:$0xf0]  ;;  %v1604_v57 = vld [vmem:[#allocation7 + $0x120] sm:$0xf0]  ;;  %s1352_s12 = sshll.u32 %s292_s23, 4  ;;  %s1353_s12 = int_to_ptr.vmem [resolvable:$true] %s1352_s12 }
  0x43   : > { %784 = vmatpush.bf16.msra.mxu3 %v1679_v29  ;;  %v1603_v56 = vor.u32 %v1906_v54, %v1602_v53  ;;  %v1610_v58 = vld [vmem:[#allocation7 + $0x108] sm:$0xf]  ;;  %v1607_v60 = vor.u32 %v1902_v55, %v1604_v57  ;;  %v1903_v62 = vld [vmem:[#allocation7 + $0x10c] sm:$0xf]  ;;  %v1898_v2 = vld [vmem:[#allocation7 + $0xdc] sm:$0xf0] }
  0x44   : > { %v304_v30 = vmul.f32 %v2056_v3, %v303_v5  ;;  %v1907_v59 = vld [vmem:[#allocation7 + $0x124] sm:$0xf0]  ;;  %v1612_v63 = vld [vmem:[#allocation7 + $0x128] sm:$0xf0]  ;;  %v1572_v5 = vld [vmem:[#allocation7 + $0xe0] sm:$0xf0] }
  0x45   : > { %743 = vmatpush.bf16.msra.mxu0 %v1635_v44  ;;  %v1611_v61 = vor.u32 %v1907_v59, %v1610_v58  ;;  %v1578_v6 = vld [vmem:[#allocation7 + $0xc8] sm:$0xf]  ;;  %v1895_v10 = vld [vmem:[#allocation7 + $0xcc] sm:$0xf]  ;;  %v1538_v13 = vld [vmem:[#allocation7 + $0x80] sm:$0xf] }
  0x46   : > { %v305_v31 = vadd.f32 %v2056_v3, %v304_v30  ;;  %757 = vmatpush.bf16.msra.mxu1 %v1639_v48  ;;  %771 = vmatpush.bf16.msra.mxu2 %v1643_v49  ;;  %v1899_v7 = vld [vmem:[#allocation7 + $0xe4] sm:$0xf0]  ;;  %v1580_v11 = vld [vmem:[#allocation7 + $0xe8] sm:$0xf0]  ;;  %v1890_v14 = vld [vmem:[#allocation7 + $0x9c] sm:$0xf0] }
  0x47   : > { %785 = vmatpush.bf16.msra.mxu3 %v1647_v52  ;;  %v1579_v9 = vor.u32 %v1899_v7, %v1578_v6  ;;  %v1583_v12 = vor.u32 %v1895_v10, %v1580_v11  ;;  %v1886_v15 = vld [vmem:[#allocation7 + $0x84] sm:$0xf]  ;;  %v1539_v16 = vor.u32 %v1890_v14, %v1538_v13  ;;  %v1546_v18 = vld [vmem:[#allocation7 + $0x88] sm:$0xf]  ;;  %v1887_v22 = vld [vmem:[#allocation7 + $0x8c] sm:$0xf] }
  0x48   : > { %v2460_v32 = vsel %vm306_vm0, %v2056_v3, %v305_v31  ;;  %v1894_v3 = vld [vmem:[#allocation7 + $0xc4] sm:$0xf]  ;;  %v1891_v19 = vld [vmem:[#allocation7 + $0xa4] sm:$0xf0]  ;;  %v1548_v23 = vld [vmem:[#allocation7 + $0xa8] sm:$0xf0] }
  0x49   : > { %744 = vmatpush.bf16.msra.mxu0 %v1603_v56  ;;  %v1575_v8 = vor.u32 %v1894_v3, %v1572_v5  ;;  %v1540_v17 = vld [vmem:[#allocation7 + $0xa0] sm:$0xf0]  ;;  %v1547_v21 = vor.u32 %v1891_v19, %v1546_v18  ;;  %v1551_v24 = vor.u32 %v1887_v22, %v1548_v23  ;;  %v1506_v25 = vld [vmem:[#allocation7 + $0x40] sm:$0xf]  ;;  %v1514_v30 = vld [vmem:[#allocation7 + $0x48] sm:$0xf] }
  0x4a   : > { %758 = vmatpush.bf16.msra.mxu1 %v1607_v60  ;;  %772 = vmatpush.bf16.msra.mxu2 %v1611_v61  ;;  %v1543_v20 = vor.u32 %v1886_v15, %v1540_v17  ;;  %v1882_v26 = vld [vmem:[#allocation7 + $0x5c] sm:$0xf0]  ;;  %v1878_v27 = vld [vmem:[#allocation7 + $0x44] sm:$0xf]  ;;  %v1883_v31 = vld [vmem:[#allocation7 + $0x64] sm:$0xf0] }
  0x4b   : > { %v1507_v28 = vor.u32 %v1882_v26, %v1506_v25  ;;  %v1508_v29 = vld [vmem:[#allocation7 + $0x60] sm:$0xf0]  ;;  %v1874_v41 = vld [vmem:[#allocation7 + $0x1c] sm:$0xf0]  ;;  %v1482_v45 = vld [vmem:[#allocation7 + $0x8] sm:$0xf] }
  0x4c   : > { %v1870_v42 = vld [vmem:[#allocation7 + $0x4] sm:$0xf]  ;;  %v1875_v46 = vld [vmem:[#allocation7 + $0x24] sm:$0xf0]  ;;  %v1871_v49 = vld [vmem:[#allocation7 + $0xc] sm:$0xf] }
  0x4d   : > { %v1476_v44 = vld [vmem:[#allocation7 + $0x20] sm:$0xf0]  ;;  %v1483_v48 = vor.u32 %v1875_v46, %v1482_v45  ;;  %v1484_v50 = vld [vmem:[#allocation7 + $0x28] sm:$0xf0]  ;;  %v1714_v51 = vld [vmem:[#allocation7 + $0x1d0] sm:$0xf] }
  0x4e   : > { %759 = vmatpush.bf16.msra.mxu1 %v1575_v8  ;;  %773 = vmatpush.bf16.msra.mxu2 %v1579_v9  ;;  %v1479_v47 = vor.u32 %v1870_v42, %v1476_v44  ;;  %v1487_v52 = vor.u32 %v1871_v49, %v1484_v50  ;;  %v1932_v53 = vld [vmem:[#allocation7 + $0x1ec] sm:$0xf0]  ;;  %v1928_v54 = vld [vmem:[#allocation7 + $0x1d4] sm:$0xf]  ;;  %v1722_v58 = vld [vmem:[#allocation7 + $0x1d8] sm:$0xf] }
  0x4f   : > { %v1716_v55 = vld [vmem:[#allocation7 + $0x1f0] sm:$0xf0]  ;;  %v1715_v56 = vor.u32 %v1932_v53, %v1714_v51  ;;  %v1933_v59 = vld [vmem:[#allocation7 + $0x1f4] sm:$0xf0]  ;;  %v1929_v60 = vld [vmem:[#allocation7 + $0x1dc] sm:$0xf] }
  0x50   : > { %v1719_v57 = vor.u32 %v1928_v54, %v1716_v55  ;;  %v1723_v61 = vor.u32 %v1933_v59, %v1722_v58  ;;  %v1920_v3 = vld [vmem:[#allocation7 + $0x194] sm:$0xf]  ;;  %v1690_v5 = vld [vmem:[#allocation7 + $0x198] sm:$0xf]  ;;  %v1921_v8 = vld [vmem:[#allocation7 + $0x19c] sm:$0xf] }
  0x51   : > { %v1925_v7 = vld [vmem:[#allocation7 + $0x1b4] sm:$0xf0]  ;;  %v1692_v9 = vld [vmem:[#allocation7 + $0x1b8] sm:$0xf0]  ;;  %v1916_v13 = vld [vmem:[#allocation7 + $0x16c] sm:$0xf0] }
  0x52   : > { %760 = vmatpush.bf16.msra.mxu1 %v1543_v20  ;;  %774 = vmatpush.bf16.msra.mxu2 %v1547_v21  ;;  %v1691_v10 = vor.u32 %v1925_v7, %v1690_v5  ;;  %v1695_v11 = vor.u32 %v1921_v8, %v1692_v9  ;;  %v1912_v14 = vld [vmem:[#allocation7 + $0x154] sm:$0xf]  ;;  %v1658_v17 = vld [vmem:[#allocation7 + $0x158] sm:$0xf]  ;;  %v1913_v21 = vld [vmem:[#allocation7 + $0x15c] sm:$0xf] }
  0x53   : > { %v1917_v18 = vld [vmem:[#allocation7 + $0x174] sm:$0xf0]  ;;  %v1660_v22 = vld [vmem:[#allocation7 + $0x178] sm:$0xf0]  ;;  %v1618_v26 = vld [vmem:[#allocation7 + $0x110] sm:$0xf] }
  0x54   : > { %v1659_v20 = vor.u32 %v1917_v18, %v1658_v17  ;;  %v1586_v42 = vld [vmem:[#allocation7 + $0xd0] sm:$0xf]  ;;  %v1896_v44 = vld [vmem:[#allocation7 + $0xd4] sm:$0xf]  ;;  %v1596_v53 = vld [vmem:[#allocation7 + $0xf8] sm:$0xf0] }
  0x55   : > { %v1588_v46 = vld [vmem:[#allocation7 + $0xf0] sm:$0xf0]  ;;  %v1554_v54 = vld [vmem:[#allocation7 + $0x90] sm:$0xf]  ;;  %s1354_s13 = sshll.u32 %s1351_s11, 4  ;;  %s1340_s22 = scalar_lea.sflag [#allocation4], %s2442_s17  ;;  %s1355_s13 = int_to_ptr.hbm [resolvable:$true] %s1354_s13 }
  0x56   : > { %v1591_v50 = vor.u32 %v1896_v44, %v1588_v46  ;;  %v1888_v58 = vld [vmem:[#allocation7 + $0x94] sm:$0xf]  ;;  %v1522_v5 = vld [vmem:[#allocation7 + $0x50] sm:$0xf]  ;;  %v2053_v44 = vld [vmem:[#allocation5] ss:$0 sm:$0xff] }
  0x57   : > { %v1556_v59 = vld [vmem:[#allocation7 + $0xb0] sm:$0xf0]  ;;  %v1884_v7 = vld [vmem:[#allocation7 + $0x6c] sm:$0xf0]  ;;  %s2227_s14 = sshra.s32 %s1355_s13, 4  ;;  %s2233_s6 = scalar_lea.hbm %s2717_s5, 32  ;;  %s2228_s14 = int_to_ptr.hbm [resolvable:$true] %s2227_s14 }
  0x58   : > { %v1880_v8 = vld [vmem:[#allocation7 + $0x54] sm:$0xf]  ;;  %v1490_v17 = vld [vmem:[#allocation7 + $0x10] sm:$0xf]  ;;  %s2229_s10 = scalar_lea.hbm %s2228_s14, 16  ;;  %p2234_p9 = scmp.lt.s32.totalorder %s2228_s14, %s2717_s5 }
  0x59   : > { %v1524_v9 = vld [vmem:[#allocation7 + $0x70] sm:$0xf0]  ;;  %p2230_p1 = scmp.ne.s32.totalorder %s2228_s14, %s2229_s10  ;;  %p2235_p10 = scmp.lt.s32.totalorder %s2233_s6, %s2229_s10 }
  0x5b   : > { %p2231_p4 = pnand %p2230_p1, %p2414_p7  ;;  %p2236_p2 = por %p2235_p10, %p2234_p9 }
  0x5d   : > { %p2232_p8 = pneg %p2231_p4 }
  0x5f   : > { %p2237_p11 = pnand %p2236_p2, %p2232_p8 }
  0xac   : > { %v298_v33 = vpop.xlane.xlu0 %297 }
  0xad   : > { %v308_v34 = vmul.f32 %v2460_v32, %v298_v33  ;;  %v1511_v33 = vor.u32 %v1878_v27, %v1508_v29  ;;  %v1908_v27 = vld [vmem:[#allocation7 + $0x12c] sm:$0xf0] }
  0xae   : > { %v1619_v29 = vor.u32 %v1908_v27, %v1618_v26  ;;  %v1873_v26 = vld [vmem:[#allocation7 + $0x1c] sm:$0xf] }
  0xaf   : > { %v2463_v35 = vsub.f32 %v295_v0, %v308_v34  ;;  %v1615_v0 = vor.u32 %v1903_v62, %v1612_v63  ;;  %v1515_v34 = vor.u32 %v1883_v31, %v1514_v30  ;;  %761 = vmatpush.bf16.msra.mxu1 %v1511_v33  ;;  %v1724_v62 = vld [vmem:[#allocation7 + $0x1f8] sm:$0xf0]  ;;  %v1682_v63 = vld [vmem:[#allocation7 + $0x190] sm:$0xf]  ;;  %v1620_v30 = vld [vmem:[#allocation7 + $0x130] sm:$0xf0] }
  0xb0   : > { %v1626_v31 = vld [vmem:[#allocation7 + $0x118] sm:$0xf]  ;;  %v1500_v27 = vld [vmem:[#allocation7 + $0x38] sm:$0xf0] }
  0xb1   : > { %v312_v36 = vmul.f32 %v2463_v35, %v2463_v35  ;;  %786 = vmatpush.bf16.msra.mxu3 %v1615_v0  ;;  %775 = vmatpush.bf16.msra.mxu2 %v1515_v34  ;;  %v1924_v0 = vld [vmem:[#allocation7 + $0x1ac] sm:$0xf0]  ;;  %v1909_v33 = vld [vmem:[#allocation7 + $0x134] sm:$0xf0] }
  0xb3   : > { %314 = vadd.xlane.f32.xlu1 %v312_v36  ;;  %v1879_v36 = vld [vmem:[#allocation7 + $0x4c] sm:$0xf]  ;;  %762 = vmatpush.bf16.msra.mxu1 %v1479_v47  ;;  %v1594_v47 = vld [vmem:[#allocation7 + $0xd8] sm:$0xf] }
  0xb4   : > { %v300_v37 = vpop.xlane.xlu0 %299 }
  0xb5   : > { %v309_v38 = vmul.f32 %v2460_v32, %v300_v37  ;;  %787 = vmatpush.bf16.msra.mxu3 %v1583_v12  ;;  %v1516_v37 = vld [vmem:[#allocation7 + $0x68] sm:$0xf0]  ;;  %776 = vmatpush.bf16.msra.mxu2 %v1483_v48  ;;  %v1650_v12 = vld [vmem:[#allocation7 + $0x150] sm:$0xf]  ;;  %v1901_v48 = vld [vmem:[#allocation7 + $0xf4] sm:$0xf0] }
  0xb6   : > { %v1651_v15 = vor.u32 %v1916_v13, %v1650_v12  ;;  %v1595_v51 = vor.u32 %v1901_v48, %v1594_v47  ;;  %v1523_v13 = vor.u32 %v1884_v7, %v1522_v5  ;;  %v1963_v5 = vld [vmem:[#allocation8 + $0xe8] sm:$0xff]  ;;  %v1937_v7 = vld [vmem:[#allocation8 + $0x18] sm:$0xff] }
  0xb7   : > { %v2468_v39 = vsub.f32 %v296_v1, %v309_v38  ;;  %v1570_v1 = vld [vmem:[#allocation7 + $0xc0] sm:$0xf]  ;;  %v1519_v38 = vor.u32 %v1879_v36, %v1516_v37  ;;  %811 = vmatpush.bf16.msrb.mxu1 %v1719_v57  ;;  %v1627_v37 = vor.u32 %v1909_v33, %v1626_v31  ;;  %v1892_v57 = vld [vmem:[#allocation7 + $0xac] sm:$0xf0] }
  0xb8   : > { %v1571_v4 = vor.u32 %v1898_v2, %v1570_v1  ;;  %v1727_v1 = vor.u32 %v1929_v60, %v1724_v62  ;;  %v1683_v2 = vor.u32 %v1924_v0, %v1682_v63  ;;  %v1555_v60 = vor.u32 %v1892_v57, %v1554_v54  ;;  %v1562_v62 = vld [vmem:[#allocation7 + $0x98] sm:$0xf]  ;;  %v1889_v0 = vld [vmem:[#allocation7 + $0x9c] sm:$0xf] }
  0xb9   : > { %v313_v40 = vmul.f32 %v2468_v39, %v2468_v39  ;;  %788 = vmatpush.bf16.msra.mxu3 %v1551_v24  ;;  %825 = vmatpush.bf16.msrb.mxu2 %v1723_v61  ;;  %v1663_v24 = vor.u32 %v1913_v21, %v1660_v22  ;;  %v1559_v61 = vor.u32 %v1888_v58, %v1556_v59  ;;  %v1893_v63 = vld [vmem:[#allocation7 + $0xb4] sm:$0xf0]  ;;  %v1492_v21 = vld [vmem:[#allocation7 + $0x30] sm:$0xf0]  ;;  %v1939_v58 = vld [vmem:[#allocation8 + $0x28] sm:$0xff] }
  0xba   : > { %745 = vmatpush.bf16.msra.mxu0 %v1571_v4  ;;  %v1684_v4 = vld [vmem:[#allocation7 + $0x1b0] sm:$0xf0]  ;;  %v1949_v54 = vld [vmem:[#allocation8 + $0x78] sm:$0xff]  ;;  %v1947_v59 = vld [vmem:[#allocation8 + $0x68] sm:$0xff] }
  0xbb   : > { %316 = vadd.xlane.f32.xlu1 %v313_v40  ;;  %v1474_v40 = vld [vmem:[#allocation7] sm:$0xf]  ;;  %v1687_v6 = vor.u32 %v1920_v3, %v1684_v4  ;;  %v1563_v3 = vor.u32 %v1893_v63, %v1562_v62  ;;  %v1564_v4 = vld [vmem:[#allocation7 + $0xb8] sm:$0xf0] }
  0xbc   : > { %v1475_v43 = vor.u32 %v1874_v41, %v1474_v40  ;;  %v1628_v40 = vld [vmem:[#allocation7 + $0x138] sm:$0xf0] }
  0xbd   : > { %789 = vmatpush.bf16.msra.mxu3 %v1519_v38  ;;  %812 = vmatpush.bf16.msrb.mxu1 %v1687_v6  ;;  %v1905_v38 = vld [vmem:[#allocation7 + $0x11c] sm:$0xf] }
  0xbe   : > { %746 = vmatpush.bf16.msra.mxu0 %v1539_v16  ;;  %v1652_v16 = vld [vmem:[#allocation7 + $0x170] sm:$0xf0]  ;;  %826 = vmatpush.bf16.msrb.mxu2 %v1691_v10  ;;  %v1631_v41 = vor.u32 %v1905_v38, %v1628_v40  ;;  %v1530_v10 = vld [vmem:[#allocation7 + $0x58] sm:$0xf]  ;;  %v1503_v38 = vor.u32 %v1873_v26, %v1500_v27  ;;  %v1935_v26 = vld [vmem:[#allocation8 + $0x8] sm:$0xff] }
  0xbf   : > { %v1655_v19 = vor.u32 %v1912_v14, %v1652_v16  ;;  %v1527_v14 = vor.u32 %v1880_v8, %v1524_v9  ;;  %v1532_v16 = vld [vmem:[#allocation7 + $0x78] sm:$0xf0]  ;;  %v1943_v27 = vld [vmem:[#allocation8 + $0x48] sm:$0xff] }
  0xc0   : > { %v1965_v57 = vld [vmem:[#allocation8 + $0xf8] sm:$0xff] }
  0xc1   : > { %790 = vmatpush.bf16.msra.mxu3 %v1487_v52  ;;  %813 = vmatpush.bf16.msrb.mxu1 %v1655_v19  ;;  %v1897_v52 = vld [vmem:[#allocation7 + $0xdc] sm:$0xf]  ;;  %v1876_v19 = vld [vmem:[#allocation7 + $0x2c] sm:$0xf0] }
  0xc2   : > { %747 = vmatpush.bf16.msra.mxu0 %v1507_v28  ;;  %v1904_v28 = vld [vmem:[#allocation7 + $0x114] sm:$0xf]  ;;  %827 = vmatpush.bf16.msrb.mxu2 %v1659_v20  ;;  %v1945_v8 = vld [vmem:[#allocation8 + $0x58] sm:$0xff] }
  0xc3   : > { %v1623_v36 = vor.u32 %v1904_v28, %v1620_v30  ;;  %v1872_v20 = vld [vmem:[#allocation7 + $0x14] sm:$0xf] }
  0xc4   : > { %v1495_v30 = vor.u32 %v1872_v20, %v1492_v21  ;;  %v1936_v21 = vld [vmem:[#allocation8 + $0x10] sm:$0xff] }
  0xc5   : > { %839 = vmatpush.bf16.msrb.mxu3 %v1727_v1  ;;  %814 = vmatpush.bf16.msrb.mxu1 %v1623_v36 }
  0xc6   : > { %748 = vmatpush.bf16.msra.mxu0 %v1475_v43  ;;  %v1900_v43 = vld [vmem:[#allocation7 + $0xec] sm:$0xf0]  ;;  %828 = vmatpush.bf16.msrb.mxu2 %v1627_v37 }
  0xc7   : > { %v1587_v45 = vor.u32 %v1900_v43, %v1586_v42 }
  0xc9   : > { %840 = vmatpush.bf16.msrb.mxu3 %v1695_v11  ;;  %815 = vmatpush.bf16.msrb.mxu1 %v1591_v50  ;;  %v1885_v11 = vld [vmem:[#allocation7 + $0x74] sm:$0xf0] }
  0xca   : > { %797 = vmatpush.bf16.msrb.mxu0 %v1715_v56  ;;  %v1599_v56 = vor.u32 %v1897_v52, %v1596_v53  ;;  %829 = vmatpush.bf16.msrb.mxu2 %v1595_v51  ;;  %v1531_v18 = vor.u32 %v1885_v11, %v1530_v10 }
  0xcd   : > { %841 = vmatpush.bf16.msrb.mxu3 %v1663_v24  ;;  %816 = vmatpush.bf16.msrb.mxu1 %v1559_v61  ;;  %v1498_v24 = vld [vmem:[#allocation7 + $0x18] sm:$0xf] }
  0xce   : > { %798 = vmatpush.bf16.msrb.mxu0 %v1683_v2  ;;  %830 = vmatpush.bf16.msrb.mxu2 %v1563_v3  ;;  %v1946_v3 = vld [vmem:[#allocation8 + $0x60] sm:$0xff] }
  0xd1   : > { %842 = vmatpush.bf16.msrb.mxu3 %v1631_v41  ;;  %817 = vmatpush.bf16.msrb.mxu1 %v1527_v14  ;;  %v1954_v14 = vld [vmem:[#allocation8 + $0xa0] sm:$0xff] }
  0xd2   : > { %799 = vmatpush.bf16.msrb.mxu0 %v1651_v15  ;;  %v1881_v15 = vld [vmem:[#allocation7 + $0x5c] sm:$0xf]  ;;  %831 = vmatpush.bf16.msrb.mxu2 %v1531_v18 }
  0xd5   : > { %843 = vmatpush.bf16.msrb.mxu3 %v1599_v56  ;;  %818 = vmatpush.bf16.msrb.mxu1 %v1495_v30  ;;  %v1948_v56 = vld [vmem:[#allocation8 + $0x70] sm:$0xff] }
  0xd6   : > { %800 = vmatpush.bf16.msrb.mxu0 %v1619_v29  ;;  %v1491_v29 = vor.u32 %v1876_v19, %v1490_v17 }
  0xda   : > { %801 = vmatpush.bf16.msrb.mxu0 %v1587_v45 }
  0xde   : > { %802 = vmatpush.bf16.msrb.mxu0 %v1555_v60 }
  0xe2   : > { %803 = vmatpush.bf16.msrb.mxu0 %v1523_v13 }
  0xe6   : > { %804 = vmatpush.bf16.msrb.mxu0 %v1491_v29 }
 0x126   : > { %v315_v23 = vpop.xlane.xlu1 %314 }
 0x127   : > { %v318_v25 = vmul.f32 %v315_v23, %v2460_v32  ;;  %v1535_v23 = vor.u32 %v1881_v15, %v1532_v16  ;;  %v1962_v15 = vld [vmem:[#allocation8 + $0xe0] sm:$0xff] }
 0x129   : > { %v2473_v34 = vadd.f32 1e-05, %v318_v25  ;;  %v1877_v25 = vld [vmem:[#allocation7 + $0x34] sm:$0xf0] }
 0x12a   : > { %v1499_v33 = vor.u32 %v1877_v25, %v1498_v24  ;;  %v1961_v24 = vld [vmem:[#allocation8 + $0xd8] sm:$0xff] }
 0x12b   : > { %2057 = vrsqrt.f32 %v2473_v34  ;;  %vm328_vm2 = vweird.f32 %v2473_v34 }
 0x12c   : > { %832 = vmatpush.bf16.msrb.mxu2 %v1499_v33  ;;  %v1952_v33 = vld [vmem:[#allocation8 + $0x90] sm:$0xff] }
 0x12e   : > { %v317_v49 = vpop.xlane.xlu1 %316 }
 0x12f   : > { %v319_v55 = vmul.f32 %v317_v49, %v2460_v32  ;;  %v1567_v32 = vor.u32 %v1889_v0, %v1564_v4  ;;  %v1956_v0 = vld [vmem:[#allocation8 + $0xb0] sm:$0xff]  ;;  %v1955_v4 = vld [vmem:[#allocation8 + $0xa8] sm:$0xff] }
 0x131   : > { %v2058_v1 = vpop.eup %2057  ;;  %v321_v2 = vadd.f32 1e-05, %v319_v55  ;;  %844 = vmatpush.bf16.msrb.mxu3 %v1567_v32  ;;  %v1940_v55 = vld [vmem:[#allocation8 + $0x30] sm:$0xff] }
 0x132   : > { %v323_v6 = vmul.f32 %v2058_v1, %v2473_v34  ;;  %vm329_vm1 = vweird.f32 %v2058_v1  ;;  %v2054_v34 = vld [vmem:[%s2714_s2] ss:$0 sm:$0xff] }
 0x133   : > { %2059 = vrsqrt.f32 %v321_v2  ;;  %vm330_vm3 = vmor %vm328_vm2, %vm329_vm1  ;;  %vm338_vm5 = vweird.f32 %v321_v2 }
 0x134   : > { %v324_v12 = vmul.f32 %v2058_v1, %v323_v6 }
 0x135   : > { %845 = vmatpush.bf16.msrb.mxu3 %v1535_v23  ;;  %v1953_v23 = vld [vmem:[#allocation8 + $0x98] sm:$0xff] }
 0x136   : > { %v325_v22 = vmul.f32 0.5, %v324_v12 }
 0x138   : > { %v326_v28 = vsub.f32 1.5, %v325_v22  ;;  %v1944_v22 = vld [vmem:[#allocation8 + $0x50] sm:$0xff] }
 0x139   : > { %v2060_v31 = vpop.eup %2059  ;;  %846 = vmatpush.bf16.msrb.mxu3 %v1503_v38 }
 0x13a   : > { %v327_v36 = vmul.f32 %v2058_v1, %v326_v28  ;;  %v333_v37 = vmul.f32 %v2060_v31, %v321_v2  ;;  %vm339_vm4 = vweird.f32 %v2060_v31  ;;  %v1938_v2 = vld [vmem:[#allocation8 + $0x20] sm:$0xff] }
 0x13b   : > { %vm340_vm6 = vmor %vm338_vm5, %vm339_vm4 }
 0x13c   : > { %v334_v40 = vmul.f32 %v2060_v31, %v333_v37  ;;  %v331_v41 = vsel %vm330_vm3, %v2058_v1, %v327_v36  ;;  %v1964_v1 = vld [vmem:[#allocation8 + $0xf0] sm:$0xff] }
 0x13d   : > { %v342_v45 = vmul.f32 %v331_v41, %v2463_v35  ;;  %v1941_v35 = vld [vmem:[#allocation8 + $0x38] sm:$0xff]  ;;  %v1960_v36 = vld [vmem:[#allocation8 + $0xd0] sm:$0xff] }
 0x13e   : > { %v335_v42 = vmul.f32 0.5, %v334_v40 }
 0x13f   : > { %v348_v48 = vmul.f32 %v2053_v44, %v342_v45 }
 0x140   : > { %v336_v43 = vsub.f32 1.5, %v335_v42 }
 0x141   : > { %v354_v51 = vadd.f32 %v2054_v34, %v348_v48 }
 0x142   : > { %v337_v46 = vmul.f32 %v2060_v31, %v336_v43  ;;  %v1934_v43 = vld [vmem:[#allocation8] sm:$0xff] }
 0x144   : > { %v341_v47 = vsel %vm340_vm6, %v2060_v31, %v337_v46 }
 0x145   : > { %v343_v49 = vmul.f32 %v341_v47, %v2468_v39  ;;  %v1957_v39 = vld [vmem:[#allocation8 + $0xb8] sm:$0xff] }
 0x147   : > { %v349_v50 = vmul.f32 %v2053_v44, %v343_v49  ;;  %v1942_v44 = vld [vmem:[#allocation8 + $0x40] sm:$0xff]  ;;  %v1951_v49 = vld [vmem:[#allocation8 + $0x88] sm:$0xff] }
 0x149   : > { %v355_v52 = vadd.f32 %v2054_v34, %v349_v50  ;;  %v1959_v50 = vld [vmem:[#allocation8 + $0xc8] sm:$0xff] }
 0x14b   : > { %v356_v53 = vpack.c.bf16 %v355_v52, %v354_v51 }
 0x14d   : > { %749 = vmatmul.bf16.vlgmr.msra.gmra.mxu0 %v356_v53  ;;  %763 = vmatmul.bf16.vlgmr.msra.gmra.mxu1 %v356_v53 }
 0x14e   : > { %777 = vmatmul.bf16.vlgmr.msra.gmra.mxu2 %v356_v53  ;;  %791 = vmatmul.bf16.vlgmr.msra.gmra.mxu3 %v356_v53 }
 0x14f   : > { %1281 = vmatpush.bf16.msra.mxu0 %v1941_v35  ;;  %1295 = vmatpush.bf16.msra.mxu1 %v1949_v54 }
 0x150   : > { %1309 = vmatpush.bf16.msra.mxu2 %v1957_v39  ;;  %1323 = vmatpush.bf16.msra.mxu3 %v1965_v57 }
 0x153   : > { %1282 = vmatpush.bf16.msra.mxu0 %v1940_v55  ;;  %1296 = vmatpush.bf16.msra.mxu1 %v1948_v56 }
 0x154   : > { %1310 = vmatpush.bf16.msra.mxu2 %v1956_v0  ;;  %1324 = vmatpush.bf16.msra.mxu3 %v1964_v1 }
 0x157   : > { %1283 = vmatpush.bf16.msra.mxu0 %v1939_v58  ;;  %1297 = vmatpush.bf16.msra.mxu1 %v1947_v59  ;;  %v1950_v58 = vld [vmem:[#allocation8 + $0x80] sm:$0xff] }
 0x158   : > { %1311 = vmatpush.bf16.msra.mxu2 %v1955_v4  ;;  %1325 = vmatpush.bf16.msra.mxu3 %v1963_v5  ;;  %v1958_v59 = vld [vmem:[#allocation8 + $0xc0] sm:$0xff] }
 0x15b   : > { %1284 = vmatpush.bf16.msra.mxu0 %v1938_v2  ;;  %1298 = vmatpush.bf16.msra.mxu1 %v1946_v3 }
 0x15c   : > { %1312 = vmatpush.bf16.msra.mxu2 %v1954_v14  ;;  %1326 = vmatpush.bf16.msra.mxu3 %v1962_v15 }
 0x15d   : > { %805 = vmatmul.bf16.vlgmr.msrb.gmra.mxu0 %v356_v53  ;;  %819 = vmatmul.bf16.vlgmr.msrb.gmra.mxu1 %v356_v53 }
 0x15e   : > { %833 = vmatmul.bf16.vlgmr.msrb.gmra.mxu2 %v356_v53  ;;  %847 = vmatmul.bf16.vlgmr.msrb.gmra.mxu3 %v356_v53 }
 0x15f   : > { %1285 = vmatpush.bf16.msra.mxu0 %v1937_v7  ;;  %1299 = vmatpush.bf16.msra.mxu1 %v1945_v8 }
 0x160   : > { %1313 = vmatpush.bf16.msra.mxu2 %v1953_v23  ;;  %1327 = vmatpush.bf16.msra.mxu3 %v1961_v24 }
 0x163   : > { %1286 = vmatpush.bf16.msra.mxu0 %v1936_v21  ;;  %1300 = vmatpush.bf16.msra.mxu1 %v1944_v22 }
 0x164   : > { %1314 = vmatpush.bf16.msra.mxu2 %v1952_v33  ;;  %1328 = vmatpush.bf16.msra.mxu3 %v1960_v36 }
 0x167   : > { %1287 = vmatpush.bf16.msra.mxu0 %v1935_v26  ;;  %1301 = vmatpush.bf16.msra.mxu1 %v1943_v27 }
 0x168   : > { %1315 = vmatpush.bf16.msra.mxu2 %v1951_v49  ;;  %1329 = vmatpush.bf16.msra.mxu3 %v1959_v50 }
 0x16b   : > { %1288 = vmatpush.bf16.msra.mxu0 %v1934_v43  ;;  %1302 = vmatpush.bf16.msra.mxu1 %v1942_v44 }
 0x16c   : > { %1316 = vmatpush.bf16.msra.mxu2 %v1950_v58  ;;  %1330 = vmatpush.bf16.msra.mxu3 %v1958_v59 }
 0x1ca   : > { %v2484_v60 = vpop.f32.mrf.mxu0  ;;  %v2486_v61 = vpop.f32.mrf.mxu1 }
 0x1cb   : > { %v1728_v62 = vmul.f32 -1.442695, %v2484_v60  ;;  %v1729_v63 = vmul.f32 -1.442695, %v2486_v61 }
 0x1cd   : > { %2061 = vpow2.f32 %v1728_v62 }
 0x1ce   : > { %2063 = vpow2.f32 %v1729_v63 }
 0x1d1   : > { %v2490_v6 = vpop.f32.mrf.mxu2  ;;  %v2492_v32 = vpop.f32.mrf.mxu3 }
 0x1d2   : > { %v1730_v9 = vmul.f32 -1.442695, %v2490_v6  ;;  %v1731_v10 = vmul.f32 -1.442695, %v2492_v32  ;;  %v2496_v11 = vpop.f32.mrf.mxu0  ;;  %v2498_v12 = vpop.f32.mrf.mxu1 }
 0x1d3   : > { %v2062_v13 = vpop.eup %2061  ;;  %v1732_v18 = vmul.f32 -1.442695, %v2496_v11  ;;  %v1733_v20 = vmul.f32 -1.442695, %v2498_v12 }
 0x1d4   : > { %v2064_v16 = vpop.eup %2063  ;;  %v2500_v17 = vadd.f32 1.0, %v2062_v13  ;;  %2065 = vpow2.f32 %v1730_v9 }
 0x1d5   : > { %v2503_v19 = vadd.f32 1.0, %v2064_v16  ;;  %2067 = vpow2.f32 %v1731_v10 }
 0x1d6   : > { %2069 = vrcp.f32 %v2500_v17  ;;  %v894_v54 = vand.u32 2147483647, %v2500_v17  ;;  %vm890_vm7 = vweird.f32 %v2500_v17  ;;  %v896_v39 = vand.u32 2147483648, %v2500_v17 }
 0x1d7   : > { %2071 = vrcp.f32 %v2503_v19  ;;  %v909_v57 = vand.u32 2147483647, %v2503_v19  ;;  %v911_v62 = vand.u32 2147483648, %v2503_v19  ;;  %vm905_vm11 = vweird.f32 %v2503_v19 }
 0x1d8   : > { %2073 = vpow2.f32 %v1732_v18  ;;  %vm2556_vm10 = vcmp.eq.f32.partialorder %v894_v54, 8.507059e+37  ;;  %v897_v13 = vor.u32 1.1754944e-38, %v896_v39 }
 0x1d9   : > { %2075 = vpow2.f32 %v1733_v20  ;;  %v2508_v25 = vpop.f32.mrf.mxu2  ;;  %v2512_v31 = vpop.f32.mrf.mxu3  ;;  %vm2561_vm12 = vcmp.eq.f32.partialorder %v909_v57, 8.507059e+37  ;;  %v912_v18 = vor.u32 1.1754944e-38, %v911_v62 }
 0x1da   : > { %v2066_v28 = vpop.eup %2065  ;;  %v1734_v40 = vmul.f32 -1.442695, %v2508_v25  ;;  %v1735_v47 = vmul.f32 -1.442695, %v2512_v31  ;;  %v820_v49 = vpop.f32.mrf.mxu1 }
 0x1db   : > { %v2068_v29 = vpop.eup %2067  ;;  %v2510_v30 = vadd.f32 1.0, %v2066_v28 }
 0x1dc   : > { %v2514_v37 = vpop.eup %2069  ;;  %v2516_v38 = vadd.f32 1.0, %v2068_v29 }
 0x1dd   : > { %v2519_v41 = vpop.eup %2071  ;;  %v886_v42 = vmul.f32 %v2514_v37, %v2500_v17  ;;  %2077 = vrcp.f32 %v2510_v30  ;;  %vm891_vm8 = vweird.f32 %v2514_v37  ;;  %v924_v1 = vand.u32 2147483647, %v2510_v30 }
 0x1de   : > { %v2074_v45 = vpop.eup %2073  ;;  %v901_v46 = vmul.f32 %v2519_v41, %v2503_v19  ;;  %2079 = vrcp.f32 %v2516_v38  ;;  %vm906_vm9 = vweird.f32 %v2519_v41  ;;  %v926_v2 = vand.u32 2147483648, %v2510_v30  ;;  %vm2569_vm13 = vmor %vm890_vm7, %vm891_vm8 }
 0x1df   : > { %v2076_v34 = vpop.eup %2075  ;;  %v887_v48 = vsub.f32 1.0, %v886_v42  ;;  %2081 = vpow2.f32 %v1734_v40  ;;  %v2528_v52 = vadd.f32 1.0, %v2074_v45  ;;  %v941_v3 = vand.u32 2147483648, %v2516_v38  ;;  %vm2577_vm15 = vmor %vm905_vm11, %vm906_vm9  ;;  %v806_v45 = vpop.f32.mrf.mxu0 }
 0x1e0   : > { %v902_v51 = vsub.f32 1.0, %v901_v46  ;;  %v2530_v53 = vadd.f32 1.0, %v2076_v34  ;;  %2083 = vpow2.f32 %v1735_v47  ;;  %vm920_vm14 = vweird.f32 %v2510_v30 }
 0x1e1   : > { %v888_v35 = vmul.f32 %v2514_v37, %v887_v48  ;;  %2085 = vrcp.f32 %v2528_v52  ;;  %v927_v23 = vor.u32 1.1754944e-38, %v926_v2  ;;  %vm935_vm0 = vweird.f32 %v2516_v38 }
 0x1e2   : > { %v903_v55 = vmul.f32 %v2519_v41, %v902_v51  ;;  %2087 = vrcp.f32 %v2530_v53  ;;  %v939_v17 = vand.u32 2147483647, %v2516_v38  ;;  %v954_v24 = vand.u32 2147483647, %v2528_v52 }
 0x1e3   : > { %v2535_v56 = vpop.eup %2077  ;;  %v889_v5 = vadd.f32 %v2514_v37, %v888_v35  ;;  %vm2592_vm1 = vcmp.eq.f32.partialorder %v924_v1, 8.507059e+37  ;;  %v2596_v33 = vor.u32 1.1754944e-38, %v941_v3  ;;  %vm950_vm3 = vweird.f32 %v2528_v52 }
 0x1e4   : > { %v916_v63 = vmul.f32 %v2535_v56, %v2510_v30  ;;  %v2546_v0 = vpop.eup %2079  ;;  %v904_v7 = vadd.f32 %v2519_v41, %v903_v55  ;;  %vm921_vm2 = vweird.f32 %v2535_v56  ;;  %vm2611_vm4 = vcmp.eq.f32.partialorder %v954_v24, 8.507059e+37  ;;  %v822_v24 = vpop.f32.mrf.mxu1 }
 0x1e5   : > { %v2082_v4 = vpop.eup %2081  ;;  %v931_v9 = vmul.f32 %v2546_v0, %v2516_v38  ;;  %v893_v27 = vsel %vm2569_vm13, %v2514_v37, %v889_v5  ;;  %v956_v48 = vand.u32 2147483648, %v2528_v52  ;;  %vm2618_vm5 = vmor %vm920_vm14, %vm921_vm2  ;;  %vm2622_vm6 = vcmp.eq.f32.partialorder %v939_v17, 8.507059e+37  ;;  %v834_v38 = vpop.f32.mrf.mxu2 }
 0x1e6   : > { %v917_v8 = vsub.f32 1.0, %v916_v63  ;;  %v2084_v15 = vpop.eup %2083  ;;  %v2584_v26 = vadd.f32 1.0, %v2082_v4  ;;  %v908_v28 = vsel %vm2577_vm15, %v2519_v41, %v904_v7  ;;  %v898_v46 = vsel %vm2556_vm10, %v897_v13, %v893_v27 }
 0x1e7   : > { %v932_v21 = vsub.f32 1.0, %v931_v9  ;;  %v2086_v19 = vpop.eup %2085  ;;  %v2602_v37 = vadd.f32 1.0, %v2084_v15  ;;  %v913_v47 = vsel %vm2561_vm12, %v912_v18, %v908_v28  ;;  %v969_v55 = vand.u32 2147483647, %v2530_v53 }
 0x1e8   : > { %v918_v20 = vmul.f32 %v2535_v56, %v917_v8  ;;  %v946_v36 = vmul.f32 %v2086_v19, %v2528_v52  ;;  %v2088_v40 = vpop.eup %2087  ;;  %2089 = vrcp.f32 %v2584_v26  ;;  %vm951_vm7 = vweird.f32 %v2086_v19 }
 0x1e9   : > { %v933_v43 = vmul.f32 %v2546_v0, %v932_v21  ;;  %v961_v44 = vmul.f32 %v2088_v40, %v2530_v53  ;;  %vm936_vm8 = vweird.f32 %v2546_v0  ;;  %v971_v30 = vand.u32 2147483648, %v2530_v53  ;;  %vm952_vm10 = vmor %vm950_vm3, %vm951_vm7 }
 0x1ea   : > { %v919_v42 = vadd.f32 %v2535_v56, %v918_v20  ;;  %v947_v41 = vsub.f32 1.0, %v946_v36  ;;  %2091 = vrcp.f32 %v2602_v37  ;;  %vm966_vm9 = vweird.f32 %v2088_v40  ;;  %vm2641_vm12 = vmor %vm935_vm0, %vm936_vm8 }
 0x1eb   : > { %v962_v54 = vsub.f32 1.0, %v961_v44  ;;  %v934_v57 = vadd.f32 %v2546_v0, %v933_v43  ;;  %v1005_v63 = vmul.f32 %v898_v46, %v2484_v60  ;;  %v1006_v1 = vmul.f32 %v913_v47, %v2486_v61 }
 0x1ec   : > { %v948_v35 = vmul.f32 %v2086_v19, %v947_v41  ;;  %v923_v39 = vsel %vm2618_vm5, %v2535_v56, %v919_v42  ;;  %v957_v56 = vor.u32 1.1754944e-38, %v956_v48  ;;  %vm965_vm11 = vweird.f32 %v2530_v53 }
 0x1ed   : > { %v963_v59 = vmul.f32 %v2088_v40, %v962_v54  ;;  %vm970_vm13 = vcmp.eq.f32.partialorder %v969_v55, 8.507059e+37  ;;  %v928_v60 = vsel %vm2592_vm1, %v927_v23, %v923_v39  ;;  %vm967_vm14 = vmor %vm965_vm11, %vm966_vm9  ;;  %v972_v52 = vor.u32 1.1754944e-38, %v971_v30  ;;  %v848_v23 = vpop.f32.mrf.mxu3  ;;  %v836_v34 = vpop.f32.mrf.mxu2 }
 0x1ee   : > { %v949_v58 = vadd.f32 %v2086_v19, %v948_v35  ;;  %v2090_v62 = vpop.eup %2089  ;;  %v984_v53 = vand.u32 2147483647, %v2584_v26  ;;  %v938_v7 = vsel %vm2641_vm12, %v2546_v0, %v934_v57  ;;  %vm980_vm15 = vweird.f32 %v2584_v26 }
 0x1ef   : > { %v964_v4 = vadd.f32 %v2088_v40, %v963_v59  ;;  %v976_v5 = vmul.f32 %v2090_v62, %v2584_v26  ;;  %v986_v15 = vand.u32 2147483648, %v2584_v26  ;;  %v1013_v16 = vmul.f32 %v1005_v63, %v806_v45 }
 0x1f0   : > { %v953_v3 = vsel %vm952_vm10, %v2086_v19, %v949_v58  ;;  %v2092_v13 = vpop.eup %2091  ;;  %vm981_vm0 = vweird.f32 %v2090_v62  ;;  %v808_v19 = vpop.f32.mrf.mxu0  ;;  %v1007_v0 = vmul.f32 %v928_v60, %v2490_v6  ;;  %vm2663_vm1 = vcmp.eq.f32.partialorder %v984_v53, 8.507059e+37 }
 0x1f1   : > { %v958_v61 = vsel %vm2611_vm4, %v957_v56, %v953_v3  ;;  %v968_v9 = vsel %vm967_vm14, %v2088_v40, %v964_v4  ;;  %v977_v10 = vsub.f32 1.0, %v976_v5  ;;  %v991_v21 = vmul.f32 %v2092_v13, %v2602_v37  ;;  %vm982_vm2 = vmor %vm980_vm15, %vm981_vm0 }
 0x1f2   : > { %v1009_v8 = vmul.f32 %v958_v61, %v2496_v11  ;;  %v973_v14 = vsel %vm970_vm13, %v972_v52, %v968_v9  ;;  %v943_v11 = vsel %vm2622_vm6, %v2596_v33, %v938_v7  ;;  %v1014_v28 = vmul.f32 %v1006_v1, %v820_v49 }
 0x1f3   : > { %v1010_v18 = vmul.f32 %v973_v14, %v2498_v12  ;;  %v978_v20 = vmul.f32 %v2090_v62, %v977_v10  ;;  %v992_v12 = vsub.f32 1.0, %v991_v21  ;;  %v987_v36 = vor.u32 1.1754944e-38, %v986_v15 }
 0x1f4   : > { %v1017_v17 = vmul.f32 %v1009_v8, %v808_v19  ;;  %v999_v6 = vand.u32 2147483647, %v2602_v37  ;;  %v1001_v40 = vand.u32 2147483648, %v2602_v37  ;;  %vm996_vm3 = vweird.f32 %v2092_v13 }
 0x1f5   : > { %v979_v27 = vadd.f32 %v2090_v62, %v978_v20  ;;  %v1018_v29 = vmul.f32 %v1010_v18, %v822_v24  ;;  %v993_v43 = vmul.f32 %v2092_v13, %v992_v12  ;;  %vm995_vm4 = vweird.f32 %v2602_v37  ;;  %v850_v55 = vpop.f32.mrf.mxu3 }
 0x1f6   : > { %v1021_v33 = vpack.c.bf16 %v1017_v17, %v1013_v16  ;;  %v1008_v26 = vmul.f32 %v943_v11, %v2492_v32  ;;  %vm997_vm5 = vmor %vm995_vm4, %vm996_vm3  ;;  %v1002_v47 = vor.u32 1.1754944e-38, %v1001_v40  ;;  %vm1000_vm6 = vcmp.eq.f32.partialorder %v999_v6, 8.507059e+37 }
 0x1f7   : > { %v983_v42 = vsel %vm982_vm2, %v2090_v62, %v979_v27  ;;  %v1022_v41 = vpack.c.bf16 %v1018_v29, %v1014_v28  ;;  %v994_v46 = vadd.f32 %v2092_v13, %v993_v43  ;;  %v1015_v49 = vmul.f32 %v1007_v0, %v834_v38 }
 0x1f8   : > { %v988_v44 = vsel %vm2663_vm1, %v987_v36, %v983_v42  ;;  %1289 = vmatmul.bf16.vlgmr.msra.gmra.mxu0 %v1021_v33 }
 0x1f9   : > { %v1011_v45 = vmul.f32 %v988_v44, %v2508_v25  ;;  %1303 = vmatmul.bf16.vlgmr.msra.gmra.mxu1 %v1022_v41  ;;  %v998_v48 = vsel %vm997_vm5, %v2092_v13, %v994_v46  ;;  %v1016_v25 = vmul.f32 %v1008_v26, %v848_v23 }
 0x1fa   : > { %v1003_v51 = vsel %vm1000_vm6, %v1002_v47, %v998_v48 }
 0x1fb   : > { %v1019_v50 = vmul.f32 %v1011_v45, %v836_v34  ;;  %v1012_v35 = vmul.f32 %v1003_v51, %v2512_v31 }
 0x1fd   : > { %v1023_v54 = vpack.c.bf16 %v1019_v50, %v1015_v49  ;;  %v1020_v39 = vmul.f32 %v1012_v35, %v850_v55 }
 0x1ff   : > { %1317 = vmatmul.bf16.vlgmr.msra.gmra.mxu2 %v1023_v54  ;;  %v1024_v37 = vpack.c.bf16 %v1020_v39, %v1016_v25 }
 0x201   : > { %1331 = vmatmul.bf16.vlgmr.msra.gmra.mxu3 %v1024_v37 }
 0x275   : > { %v1290_v32 = vpop.f32.mrf.mxu0 }
 0x276   : > { %v1304_v30 = vpop.f32.mrf.mxu1 }
 0x277   : > { %v1305_v57 = vadd.f32 %v1304_v30, %v1290_v32 }
 0x27d   : > { %v1292_v62 = vpop.f32.mrf.mxu0 }
 0x27e   : > { %v1306_v63 = vpop.f32.mrf.mxu1 }
 0x27f   : > { %v1307_v56 = vadd.f32 %v1306_v63, %v1292_v62 }
 0x282   : > { %v1318_v58 = vpop.f32.mrf.mxu2 }
 0x283   : > { %v1319_v59 = vadd.f32 %v1318_v58, %v1305_v57 }
 0x284   : > { %v1332_v1 = vpop.f32.mrf.mxu3 }
 0x285   : > { %v1333_v31 = vadd.f32 %v1332_v1, %v1319_v59 }
 0x287   : > { %1337 = vst [vmem:[%s292_s23] sm:$0xff] %v1333_v31 }
 0x28a   : > { %v1320_v2 = vpop.f32.mrf.mxu2 }
 0x28b   : > { %v1321_v3 = vadd.f32 %v1320_v2, %v1307_v56 }
 0x28c   : > { %v1334_v4 = vpop.f32.mrf.mxu3 }
 0x28d   : > { %v1335_v5 = vadd.f32 %v1334_v4, %v1321_v3 }
 0x28f   : > { %1338 = vst [vmem:[%s292_s23 + $0x8] sm:$0xff] %v1335_v5 }
 0x290   : > { %2240 = shalt.err (!%p2237_p11)
}
 0x291   : > { %s2299_s17 = smov 128   ;;  %s2300_s29 = smov 8  }
 0x292   : > { %1981 = dma.vmem_to_hbm [thread:$0]  (%p2414_p7), %s1353_s12, 256, %s1355_s13, %s1340_s22, %s2299_s17, %s2299_s17, %s2300_s29  }
 0x293 PF: > { %s1369_s16 = sand.u32 1, %s2275_s18   ;;  %p2744_p12 = scmp.ge.s32.totalorder %s2287_s21, 2 }
 0x294   : > { %s1370_s23 = scalar_lea.sflag [#allocation4], %s1369_s16 }
 0x295   : > { %p1998_p13 = pnand %p2744_p12, %p2366_p6 }
 0x297   : > { %p1999_p0 = pneg %p1998_p13 }
 0x299   : > { %2270 = dma.done.wait (%p1999_p0), %s1370_s23, 256  }
 0x29a   : > { %2272 = vsyncadd (%p1999_p0), %s1370_s23, 4294967040  ;;  %p20_p3 = scmp.ge.s32.totalorder %s2400_s30, 4   ;;  %s2745_s18 = smov %s2279_s19 }
 0x29b   : > { %s2746_s19 = smov %s2283_s20  ;;  %s2747_s20 = smov %s2410_s8 }
 0x29c   : > { %s2748_s21 = smov %s2400_s30  ;;  %22 = sbr.rel (!%p20_p3) target bundleno = 7 (0x7), region = 97 }
 0x2a1   :  { %1376 = vsyncpa [#allocation3], 1 }
 0x2a2   :  { %1378 = vsyncpa [#allocation3 + $0x1], 1 }
 0x2a3   :  { %1379 = vsyncpa [#allocation6], 1 }
 0x2a4   :  { %1380 = vsyncpa [#allocation9], 1 }
 0x2a5   :  { %1381 = vsyncpa [#allocation4], 1 }
 0x2a6   :  { %1383 = vsyncpa [#allocation4 + $0x1], 1 }

// kernel: tpu_custom_call.1
= control target key start
LH: loop header
LB: loop body
LE: loop exit
PB: predicated region body
PF: predicated region fallthrough
CT: control target
= control target key end

     0   :  { %10 = vsyncpa [#allocation3], 0  ;;  %s2712_s0 = inlined_call_operand.hbm [shape: f32[32,128], index: 0, kind: input, shape index: {}]   ;;  %s2713_s1 = inlined_call_operand.hbm [shape: f32[1,128], index: 1, kind: input, shape index: {}]   ;;  %s2714_s2 = inlined_call_operand.vmem [shape: f32[1,128], index: 2, kind: input, shape index: {}]   ;;  %s2715_s3 = inlined_call_operand.hbm [shape: bf16[128,1024], index: 3, kind: input, shape index: {}]   ;;  %s2716_s4 = inlined_call_operand.hbm [shape: bf16[512,128], index: 4, kind: input, shape index: {}]   ;;  %s2717_s5 = inlined_call_operand.hbm [shape: f32[32,128], index: 5, kind: output, shape index: {}]  }
   0x1   :  { %12 = vsyncpa [#allocation3 + $0x1], 0 }
   0x2   :  { %13 = vsyncpa [#allocation6], 0 }
   0x3   :  { %14 = vsyncpa [#allocation9], 0 }
   0x4   :  { %15 = vsyncpa [#allocation4], 0 }
   0x5   :  { %17 = vsyncpa [#allocation4 + $0x1], 0  ;;  %s2331_s18 = smov 0   ;;  %s2333_s19 = smov 0  }
   0x6   :  { %s2335_s20 = smov 0   ;;  %s2337_s21 = smov 0  }
   0x7 LB: > { %s2352_s22 = sadd.s32 4294967295, %s2287_s21   ;;  %s1457_s23 = sadd.s32 4294967294, %s2287_s21   ;;  %s2287_s21 = sphi %s2337_s21, %s2748_s21   ;;  %s2283_s20 = sphi %s2335_s20, %s2747_s20   ;;  %s2279_s19 = sphi %s2333_s19, %s2746_s19   ;;  %s2275_s18 = sphi %s2331_s18, %s2745_s18  }
   0x8   : > { %p43_p0 = scmp.ne.s32.totalorder %s2279_s19, %s2275_s18  ;;  %p44_p1 = scmp.eq.s32.totalorder %s2352_s22, 0 }
   0x9   : > { %p151_p2 = scmp.eq.s32.totalorder %s2352_s22, 1  ;;  %p157_p3 = scmp.eq.s32.totalorder %s1457_s23, 1 }
   0xa   : > { %p2361_p4 = por %p44_p1, %p43_p0  ;;  %p1458_p5 = scmp.ge.s32.totalorder %s2287_s21, 1 }
   0xb   : > { %p2366_p6 = por %p157_p3, %p43_p0  ;;  %p164_p7 = scmp.lt.s32.totalorder %s2287_s21, 3 }
   0xc   : > { %s176_s28 = sshll.u32 %s2713_s1, 4  ;;  %s2289_s30 = smov [#allocation5]   ;;  %s177_s28 = int_to_ptr.hbm [resolvable:$true] %s176_s28 }
   0xd   : > { %p2374_p8 = pnand %p1458_p5, %p164_p7  ;;  %s178_s6 = sshll.u32 %s2289_s30, 4  ;;  %s179_s6 = int_to_ptr.vmem [resolvable:$true] %s178_s6 }
   0xe   : > { %s190_s9 = sshll.u32 %s2715_s3, 4  ;;  %s2290_s11 = smov [#allocation7]   ;;  %s191_s9 = int_to_ptr.hbm [resolvable:$true] %s190_s9 }
   0xf   : > { %p1983_p10 = pneg %p2374_p8  ;;  %s192_s12 = sshll.u32 %s2290_s11, 4  ;;  %s193_s12 = int_to_ptr.vmem [resolvable:$true] %s192_s12 }
  0x10   : > { %s2291_s13 = smov 512   ;;  %s2292_s14 = smov 32  }
  0x11   : > { %p2386_p11 = pnand %p1983_p10, %p44_p1  ;;  %s204_s17 = sshll.u32 %s2716_s4, 4  ;;  %s205_s17 = int_to_ptr.hbm [resolvable:$true] %s204_s17 }
  0x12   : > { %s2293_s23 = smov [#allocation8]   ;;  %s2294_s27 = smov 64  }
  0x13   : > { %1986 = dma.hbm_to_vmem [thread:$0]  (!%p2386_p11), %s177_s28, 16, %s179_s6, [#allocation6]  }
  0x14   : > { %1989 = dma.hbm_to_vmem [thread:$0]  (!%p2386_p11), %s191_s9, 8192, %s193_s12, [#allocation6], %s2291_s13, %s2291_s13, %s2292_s14  }
  0x15   : > { %s206_s26 = sshll.u32 %s2293_s23, 4  ;;  %s2295_s28 = smov 4   ;;  %s207_s26 = int_to_ptr.vmem [resolvable:$true] %s206_s26 }
  0x16   : > { %1992 = dma.hbm_to_vmem [thread:$0]  (!%p2386_p11), %s205_s17, 4096, %s207_s26, [#allocation9], %s2294_s27, %s2294_s27, %s2295_s28  }
  0x17   : > { %s2400_s30 = sadd.s32 1, %s2287_s21   ;;  %s30_s7 = sadd.s32 1, %s2283_s20 }
  0x18   : > { %s27_s6 = ssub.s32 %s2287_s21, %s2400_s30  ;;  %p37_p13 = scmp.ne.s32.totalorder %s2283_s20, %s2279_s19 }
  0x19   : > { %p28_p12 = scmp.eq.s32.totalorder %s27_s6, 0  ;;  %p38_p0 = scmp.eq.s32.totalorder %s2287_s21, 0 }
  0x1a   : > { %p2004_p3 = scmp.lt.s32.totalorder %s2287_s21, 2  ;;  %p2414_p7 = por %p151_p2, %p37_p13 }
  0x1b   : > { %s2410_s8 = scalar_select %p28_p12, %s2283_s20, %s30_s7  }
  0x1c   : > { %p39_p5 = por %p38_p0, %p37_p13  ;;  %s220_s10 = sand.u32 1, %s2283_s20  }
  0x1d   : > { %s1869_s11 = sshll.u32 %s2287_s21, 4  ;;  %s1463_s12 = sshll.u32 %s220_s10, 4 }
  0x1e   : > { %s229_s15 = scalar_lea.hbm %s2712_s0, %s1869_s11  ;;  %s224_s17 = scalar_lea.vmem [#allocation2], %s1463_s12 }
  0x1f   : > { %s230_s16 = sshll.u32 %s229_s15, 4  ;;  %s232_s23 = sshll.u32 %s224_s17, 4  ;;  %s231_s16 = int_to_ptr.hbm [resolvable:$true] %s230_s16  ;;  %s233_s23 = int_to_ptr.vmem [resolvable:$true] %s232_s23 }
  0x20   : > { %p2425_p10 = pnand %p2004_p3, %p39_p5  ;;  %s221_s27 = scalar_lea.sflag [#allocation3], %s220_s10 }
  0x21   : > { %s2183_s28 = sshra.s32 %s231_s16, 4  ;;  %s2190_s12 = scalar_lea.hbm %s2712_s0, 32  ;;  %s2184_s28 = int_to_ptr.hbm [resolvable:$true] %s2183_s28 }
  0x22   : > { %s2185_s6 = scalar_lea.hbm %s2184_s28, 16  ;;  %p2187_p11 = pneg %p2425_p10 }
  0x23   : > { %p2186_p2 = scmp.ne.s32.totalorder %s2184_s28, %s2185_s6  ;;  %p2191_p0 = scmp.lt.s32.totalorder %s2184_s28, %s2712_s0 }
  0x24   : > { %p2192_p3 = scmp.lt.s32.totalorder %s2190_s12, %s2185_s6 }
  0x25   : > { %p2188_p12 = pnand %p2187_p11, %p2186_p2 }
  0x26   : > { %p2193_p5 = por %p2192_p3, %p2191_p0 }
  0x27   : > { %p2189_p13 = pneg %p2188_p12 }
  0x29   : > { %p2194_p9 = pnand %p2193_p5, %p2189_p13 }
  0x2b   : > { %2197 = shalt.err (!%p2194_p9)
}
  0x2c   : > { %s2296_s10 = smov 128   ;;  %s2297_s15 = smov 8  }
  0x2d   : > { %1996 = dma.hbm_to_vmem [thread:$0]  (!%p2425_p10), %s231_s16, 256, %s233_s23, %s221_s27, %s2296_s10, %s2296_s10, %s2297_s15  }
  0x2e   : > { %244 = sbr.rel (%p2374_p8) target bundleno = 659 (0x293), region = 40  ;;  %s2442_s17 = sand.u32 (!%p2374_p8), 1, %s2279_s19  }
  0x2f   : > { %s1467_s28 = sshll.u32 (!%p2374_p8), %s2442_s17, 4  ;;  %s247_s6 = scalar_lea.sflag (!%p2374_p8), [#allocation3], %s2442_s17 }
  0x30   : > { %s250_s7 = scalar_lea.vmem (!%p2374_p8), [#allocation2], %s1467_s28 }
  0x33   : > { %2258 = dma.done.wait (%p2361_p4), %s247_s6, 256  }
  0x34   : > { %2260 = vsyncadd (%p2361_p4), %s247_s6, 4294967040 }
  0x35   : > { %2262 = dma.done.wait (%p44_p1), [#allocation6], 8208  }
  0x36   : > { %2264 = vsyncadd (%p44_p1), [#allocation6], 4294959088 }
  0x37   : > { %2266 = dma.done.wait (%p44_p1), [#allocation9], 4096  }
  0x38   : > { %2268 = vsyncadd (%p44_p1), [#allocation9], 4294963200  ;;  %v295_v0 = vld [vmem:[%s250_s7] sm:$0xff]  ;;  %v296_v1 = vld [vmem:[%s250_s7 + $0x8] sm:$0xff]  ;;  %v2298_v2 = vmov 128.0   ;;  %s1966_s16 = sshll.u32 %s2352_s22, 4 }
  0x39   : > { %297 = vadd.xlane.f32.xlu0 %v295_v0  ;;  %2055 = vrcp.f32 %v2298_v2  ;;  %v1698_v6 = vld [vmem:[#allocation7 + $0x1c0] sm:$0xf]  ;;  %v1926_v8 = vld [vmem:[#allocation7 + $0x1c4] sm:$0xf]  ;;  %v1706_v11 = vld [vmem:[#allocation7 + $0x1c8] sm:$0xf]  ;;  %s1351_s11 = scalar_lea.hbm %s2717_s5, %s1966_s16 }
  0x3a   : > { %v1930_v7 = vld [vmem:[#allocation7 + $0x1dc] sm:$0xf0]  ;;  %v1700_v10 = vld [vmem:[#allocation7 + $0x1e0] sm:$0xf0]  ;;  %v1931_v12 = vld [vmem:[#allocation7 + $0x1e4] sm:$0xf0] }
  0x3b   : > { %v1699_v9 = vor.u32 %v1930_v7, %v1698_v6  ;;  %v1703_v13 = vor.u32 %v1926_v8, %v1700_v10  ;;  %v1707_v14 = vor.u32 %v1931_v12, %v1706_v11  ;;  %v1927_v15 = vld [vmem:[#allocation7 + $0x1cc] sm:$0xf]  ;;  %v1666_v17 = vld [vmem:[#allocation7 + $0x180] sm:$0xf]  ;;  %v1918_v20 = vld [vmem:[#allocation7 + $0x184] sm:$0xf] }
  0x3c   : > { %v1708_v16 = vld [vmem:[#allocation7 + $0x1e8] sm:$0xf0]  ;;  %v1922_v19 = vld [vmem:[#allocation7 + $0x19c] sm:$0xf0]  ;;  %v1668_v21 = vld [vmem:[#allocation7 + $0x1a0] sm:$0xf0] }
  0x3d   : > { %741 = vmatpush.bf16.msra.mxu0 %v1699_v9  ;;  %v1711_v18 = vor.u32 %v1927_v15, %v1708_v16  ;;  %755 = vmatpush.bf16.msra.mxu1 %v1703_v13  ;;  %v1667_v22 = vor.u32 %v1922_v19, %v1666_v17  ;;  %v1671_v23 = vor.u32 %v1918_v20, %v1668_v21  ;;  %v1674_v24 = vld [vmem:[#allocation7 + $0x188] sm:$0xf]  ;;  %v1919_v26 = vld [vmem:[#allocation7 + $0x18c] sm:$0xf]  ;;  %v1634_v41 = vld [vmem:[#allocation7 + $0x140] sm:$0xf] }
  0x3e   : > { %769 = vmatpush.bf16.msra.mxu2 %v1707_v14  ;;  %v1923_v25 = vld [vmem:[#allocation7 + $0x1a4] sm:$0xf0]  ;;  %v1676_v28 = vld [vmem:[#allocation7 + $0x1a8] sm:$0xf0]  ;;  %v1914_v42 = vld [vmem:[#allocation7 + $0x15c] sm:$0xf0] }
  0x3f   : > { %v2056_v3 = vpop.eup %2055  ;;  %783 = vmatpush.bf16.msra.mxu3 %v1711_v18  ;;  %v1675_v27 = vor.u32 %v1923_v25, %v1674_v24  ;;  %v1679_v29 = vor.u32 %v1919_v26, %v1676_v28  ;;  %v1910_v43 = vld [vmem:[#allocation7 + $0x144] sm:$0xf]  ;;  %v1635_v44 = vor.u32 %v1914_v42, %v1634_v41  ;;  %v1642_v46 = vld [vmem:[#allocation7 + $0x148] sm:$0xf]  ;;  %v1911_v50 = vld [vmem:[#allocation7 + $0x14c] sm:$0xf] }
  0x40   : > { %v302_v4 = vmul.f32 128.0, %v2056_v3  ;;  %vm306_vm0 = vweird.f32 %v2056_v3  ;;  %v1636_v45 = vld [vmem:[#allocation7 + $0x160] sm:$0xf0]  ;;  %v1915_v47 = vld [vmem:[#allocation7 + $0x164] sm:$0xf0]  ;;  %s292_s23 = scalar_lea.vmem [#allocation10], %s1467_s28 }
  0x41   : > { %299 = vadd.xlane.f32.xlu0 %v296_v1  ;;  %742 = vmatpush.bf16.msra.mxu0 %v1667_v22  ;;  %v1639_v48 = vor.u32 %v1910_v43, %v1636_v45  ;;  %v1643_v49 = vor.u32 %v1915_v47, %v1642_v46  ;;  %v1644_v51 = vld [vmem:[#allocation7 + $0x168] sm:$0xf0]  ;;  %v1602_v53 = vld [vmem:[#allocation7 + $0x100] sm:$0xf]  ;;  %v1902_v55 = vld [vmem:[#allocation7 + $0x104] sm:$0xf] }
  0x42   : > { %v303_v5 = vsub.f32 1.0, %v302_v4  ;;  %756 = vmatpush.bf16.msra.mxu1 %v1671_v23  ;;  %770 = vmatpush.bf16.msra.mxu2 %v1675_v27  ;;  %v1647_v52 = vor.u32 %v1911_v50, %v1644_v51  ;;  %v1906_v54 = vld [vmem:[#allocation7 + $0x11c] sm:$0xf0]  ;;  %v1604_v57 = vld [vmem:[#allocation7 + $0x120] sm:$0xf0]  ;;  %s1352_s12 = sshll.u32 %s292_s23, 4  ;;  %s1353_s12 = int_to_ptr.vmem [resolvable:$true] %s1352_s12 }
  0x43   : > { %784 = vmatpush.bf16.msra.mxu3 %v1679_v29  ;;  %v1603_v56 = vor.u32 %v1906_v54, %v1602_v53  ;;  %v1610_v58 = vld [vmem:[#allocation7 + $0x108] sm:$0xf]  ;;  %v1607_v60 = vor.u32 %v1902_v55, %v1604_v57  ;;  %v1903_v62 = vld [vmem:[#allocation7 + $0x10c] sm:$0xf]  ;;  %v1898_v2 = vld [vmem:[#allocation7 + $0xdc] sm:$0xf0] }
  0x44   : > { %v304_v30 = vmul.f32 %v2056_v3, %v303_v5  ;;  %v1907_v59 = vld [vmem:[#allocation7 + $0x124] sm:$0xf0]  ;;  %v1612_v63 = vld [vmem:[#allocation7 + $0x128] sm:$0xf0]  ;;  %v1572_v5 = vld [vmem:[#allocation7 + $0xe0] sm:$0xf0] }
  0x45   : > { %743 = vmatpush.bf16.msra.mxu0 %v1635_v44  ;;  %v1611_v61 = vor.u32 %v1907_v59, %v1610_v58  ;;  %v1578_v6 = vld [vmem:[#allocation7 + $0xc8] sm:$0xf]  ;;  %v1895_v10 = vld [vmem:[#allocation7 + $0xcc] sm:$0xf]  ;;  %v1538_v13 = vld [vmem:[#allocation7 + $0x80] sm:$0xf] }
  0x46   : > { %v305_v31 = vadd.f32 %v2056_v3, %v304_v30  ;;  %757 = vmatpush.bf16.msra.mxu1 %v1639_v48  ;;  %771 = vmatpush.bf16.msra.mxu2 %v1643_v49  ;;  %v1899_v7 = vld [vmem:[#allocation7 + $0xe4] sm:$0xf0]  ;;  %v1580_v11 = vld [vmem:[#allocation7 + $0xe8] sm:$0xf0]  ;;  %v1890_v14 = vld [vmem:[#allocation7 + $0x9c] sm:$0xf0] }
  0x47   : > { %785 = vmatpush.bf16.msra.mxu3 %v1647_v52  ;;  %v1579_v9 = vor.u32 %v1899_v7, %v1578_v6  ;;  %v1583_v12 = vor.u32 %v1895_v10, %v1580_v11  ;;  %v1886_v15 = vld [vmem:[#allocation7 + $0x84] sm:$0xf]  ;;  %v1539_v16 = vor.u32 %v1890_v14, %v1538_v13  ;;  %v1546_v18 = vld [vmem:[#allocation7 + $0x88] sm:$0xf]  ;;  %v1887_v22 = vld [vmem:[#allocation7 + $0x8c] sm:$0xf] }
  0x48   : > { %v2460_v32 = vsel %vm306_vm0, %v2056_v3, %v305_v31  ;;  %v1894_v3 = vld [vmem:[#allocation7 + $0xc4] sm:$0xf]  ;;  %v1891_v19 = vld [vmem:[#allocation7 + $0xa4] sm:$0xf0]  ;;  %v1548_v23 = vld [vmem:[#allocation7 + $0xa8] sm:$0xf0] }
  0x49   : > { %744 = vmatpush.bf16.msra.mxu0 %v1603_v56  ;;  %v1575_v8 = vor.u32 %v1894_v3, %v1572_v5  ;;  %v1540_v17 = vld [vmem:[#allocation7 + $0xa0] sm:$0xf0]  ;;  %v1547_v21 = vor.u32 %v1891_v19, %v1546_v18  ;;  %v1551_v24 = vor.u32 %v1887_v22, %v1548_v23  ;;  %v1506_v25 = vld [vmem:[#allocation7 + $0x40] sm:$0xf]  ;;  %v1514_v30 = vld [vmem:[#allocation7 + $0x48] sm:$0xf] }
  0x4a   : > { %758 = vmatpush.bf16.msra.mxu1 %v1607_v60  ;;  %772 = vmatpush.bf16.msra.mxu2 %v1611_v61  ;;  %v1543_v20 = vor.u32 %v1886_v15, %v1540_v17  ;;  %v1882_v26 = vld [vmem:[#allocation7 + $0x5c] sm:$0xf0]  ;;  %v1878_v27 = vld [vmem:[#allocation7 + $0x44] sm:$0xf]  ;;  %v1883_v31 = vld [vmem:[#allocation7 + $0x64] sm:$0xf0] }
  0x4b   : > { %v1507_v28 = vor.u32 %v1882_v26, %v1506_v25  ;;  %v1508_v29 = vld [vmem:[#allocation7 + $0x60] sm:$0xf0]  ;;  %v1874_v41 = vld [vmem:[#allocation7 + $0x1c] sm:$0xf0]  ;;  %v1482_v45 = vld [vmem:[#allocation7 + $0x8] sm:$0xf] }
  0x4c   : > { %v1870_v42 = vld [vmem:[#allocation7 + $0x4] sm:$0xf]  ;;  %v1875_v46 = vld [vmem:[#allocation7 + $0x24] sm:$0xf0]  ;;  %v1871_v49 = vld [vmem:[#allocation7 + $0xc] sm:$0xf] }
  0x4d   : > { %v1476_v44 = vld [vmem:[#allocation7 + $0x20] sm:$0xf0]  ;;  %v1483_v48 = vor.u32 %v1875_v46, %v1482_v45  ;;  %v1484_v50 = vld [vmem:[#allocation7 + $0x28] sm:$0xf0]  ;;  %v1714_v51 = vld [vmem:[#allocation7 + $0x1d0] sm:$0xf] }
  0x4e   : > { %759 = vmatpush.bf16.msra.mxu1 %v1575_v8  ;;  %773 = vmatpush.bf16.msra.mxu2 %v1579_v9  ;;  %v1479_v47 = vor.u32 %v1870_v42, %v1476_v44  ;;  %v1487_v52 = vor.u32 %v1871_v49, %v1484_v50  ;;  %v1932_v53 = vld [vmem:[#allocation7 + $0x1ec] sm:$0xf0]  ;;  %v1928_v54 = vld [vmem:[#allocation7 + $0x1d4] sm:$0xf]  ;;  %v1722_v58 = vld [vmem:[#allocation7 + $0x1d8] sm:$0xf] }
  0x4f   : > { %v1716_v55 = vld [vmem:[#allocation7 + $0x1f0] sm:$0xf0]  ;;  %v1715_v56 = vor.u32 %v1932_v53, %v1714_v51  ;;  %v1933_v59 = vld [vmem:[#allocation7 + $0x1f4] sm:$0xf0]  ;;  %v1929_v60 = vld [vmem:[#allocation7 + $0x1dc] sm:$0xf] }
  0x50   : > { %v1719_v57 = vor.u32 %v1928_v54, %v1716_v55  ;;  %v1723_v61 = vor.u32 %v1933_v59, %v1722_v58  ;;  %v1920_v3 = vld [vmem:[#allocation7 + $0x194] sm:$0xf]  ;;  %v1690_v5 = vld [vmem:[#allocation7 + $0x198] sm:$0xf]  ;;  %v1921_v8 = vld [vmem:[#allocation7 + $0x19c] sm:$0xf] }
  0x51   : > { %v1925_v7 = vld [vmem:[#allocation7 + $0x1b4] sm:$0xf0]  ;;  %v1692_v9 = vld [vmem:[#allocation7 + $0x1b8] sm:$0xf0]  ;;  %v1916_v13 = vld [vmem:[#allocation7 + $0x16c] sm:$0xf0] }
  0x52   : > { %760 = vmatpush.bf16.msra.mxu1 %v1543_v20  ;;  %774 = vmatpush.bf16.msra.mxu2 %v1547_v21  ;;  %v1691_v10 = vor.u32 %v1925_v7, %v1690_v5  ;;  %v1695_v11 = vor.u32 %v1921_v8, %v1692_v9  ;;  %v1912_v14 = vld [vmem:[#allocation7 + $0x154] sm:$0xf]  ;;  %v1658_v17 = vld [vmem:[#allocation7 + $0x158] sm:$0xf]  ;;  %v1913_v21 = vld [vmem:[#allocation7 + $0x15c] sm:$0xf] }
  0x53   : > { %v1917_v18 = vld [vmem:[#allocation7 + $0x174] sm:$0xf0]  ;;  %v1660_v22 = vld [vmem:[#allocation7 + $0x178] sm:$0xf0]  ;;  %v1618_v26 = vld [vmem:[#allocation7 + $0x110] sm:$0xf] }
  0x54   : > { %v1659_v20 = vor.u32 %v1917_v18, %v1658_v17  ;;  %v1586_v42 = vld [vmem:[#allocation7 + $0xd0] sm:$0xf]  ;;  %v1896_v44 = vld [vmem:[#allocation7 + $0xd4] sm:$0xf]  ;;  %v1596_v53 = vld [vmem:[#allocation7 + $0xf8] sm:$0xf0] }
  0x55   : > { %v1588_v46 = vld [vmem:[#allocation7 + $0xf0] sm:$0xf0]  ;;  %v1554_v54 = vld [vmem:[#allocation7 + $0x90] sm:$0xf]  ;;  %s1354_s13 = sshll.u32 %s1351_s11, 4  ;;  %s1340_s22 = scalar_lea.sflag [#allocation4], %s2442_s17  ;;  %s1355_s13 = int_to_ptr.hbm [resolvable:$true] %s1354_s13 }
  0x56   : > { %v1591_v50 = vor.u32 %v1896_v44, %v1588_v46  ;;  %v1888_v58 = vld [vmem:[#allocation7 + $0x94] sm:$0xf]  ;;  %v1522_v5 = vld [vmem:[#allocation7 + $0x50] sm:$0xf]  ;;  %v2053_v44 = vld [vmem:[#allocation5] ss:$0 sm:$0xff] }
  0x57   : > { %v1556_v59 = vld [vmem:[#allocation7 + $0xb0] sm:$0xf0]  ;;  %v1884_v7 = vld [vmem:[#allocation7 + $0x6c] sm:$0xf0]  ;;  %s2227_s14 = sshra.s32 %s1355_s13, 4  ;;  %s2233_s6 = scalar_lea.hbm %s2717_s5, 32  ;;  %s2228_s14 = int_to_ptr.hbm [resolvable:$true] %s2227_s14 }
  0x58   : > { %v1880_v8 = vld [vmem:[#allocation7 + $0x54] sm:$0xf]  ;;  %v1490_v17 = vld [vmem:[#allocation7 + $0x10] sm:$0xf]  ;;  %s2229_s10 = scalar_lea.hbm %s2228_s14, 16  ;;  %p2234_p9 = scmp.lt.s32.totalorder %s2228_s14, %s2717_s5 }
  0x59   : > { %v1524_v9 = vld [vmem:[#allocation7 + $0x70] sm:$0xf0]  ;;  %p2230_p1 = scmp.ne.s32.totalorder %s2228_s14, %s2229_s10  ;;  %p2235_p10 = scmp.lt.s32.totalorder %s2233_s6, %s2229_s10 }
  0x5b   : > { %p2231_p4 = pnand %p2230_p1, %p2414_p7  ;;  %p2236_p2 = por %p2235_p10, %p2234_p9 }
  0x5d   : > { %p2232_p8 = pneg %p2231_p4 }
  0x5f   : > { %p2237_p11 = pnand %p2236_p2, %p2232_p8 }
  0xac   : > { %v298_v33 = vpop.xlane.xlu0 %297 }
  0xad   : > { %v308_v34 = vmul.f32 %v2460_v32, %v298_v33  ;;  %v1511_v33 = vor.u32 %v1878_v27, %v1508_v29  ;;  %v1908_v27 = vld [vmem:[#allocation7 + $0x12c] sm:$0xf0] }
  0xae   : > { %v1619_v29 = vor.u32 %v1908_v27, %v1618_v26  ;;  %v1873_v26 = vld [vmem:[#allocation7 + $0x1c] sm:$0xf] }
  0xaf   : > { %v2463_v35 = vsub.f32 %v295_v0, %v308_v34  ;;  %v1615_v0 = vor.u32 %v1903_v62, %v1612_v63  ;;  %v1515_v34 = vor.u32 %v1883_v31, %v1514_v30  ;;  %761 = vmatpush.bf16.msra.mxu1 %v1511_v33  ;;  %v1724_v62 = vld [vmem:[#allocation7 + $0x1f8] sm:$0xf0]  ;;  %v1682_v63 = vld [vmem:[#allocation7 + $0x190] sm:$0xf]  ;;  %v1620_v30 = vld [vmem:[#allocation7 + $0x130] sm:$0xf0] }
  0xb0   : > { %v1626_v31 = vld [vmem:[#allocation7 + $0x118] sm:$0xf]  ;;  %v1500_v27 = vld [vmem:[#allocation7 + $0x38] sm:$0xf0] }
  0xb1   : > { %v312_v36 = vmul.f32 %v2463_v35, %v2463_v35  ;;  %786 = vmatpush.bf16.msra.mxu3 %v1615_v0  ;;  %775 = vmatpush.bf16.msra.mxu2 %v1515_v34  ;;  %v1924_v0 = vld [vmem:[#allocation7 + $0x1ac] sm:$0xf0]  ;;  %v1909_v33 = vld [vmem:[#allocation7 + $0x134] sm:$0xf0] }
  0xb3   : > { %314 = vadd.xlane.f32.xlu1 %v312_v36  ;;  %v1879_v36 = vld [vmem:[#allocation7 + $0x4c] sm:$0xf]  ;;  %762 = vmatpush.bf16.msra.mxu1 %v1479_v47  ;;  %v1594_v47 = vld [vmem:[#allocation7 + $0xd8] sm:$0xf] }
  0xb4   : > { %v300_v37 = vpop.xlane.xlu0 %299 }
  0xb5   : > { %v309_v38 = vmul.f32 %v2460_v32, %v300_v37  ;;  %787 = vmatpush.bf16.msra.mxu3 %v1583_v12  ;;  %v1516_v37 = vld [vmem:[#allocation7 + $0x68] sm:$0xf0]  ;;  %776 = vmatpush.bf16.msra.mxu2 %v1483_v48  ;;  %v1650_v12 = vld [vmem:[#allocation7 + $0x150] sm:$0xf]  ;;  %v1901_v48 = vld [vmem:[#allocation7 + $0xf4] sm:$0xf0] }
  0xb6   : > { %v1651_v15 = vor.u32 %v1916_v13, %v1650_v12  ;;  %v1595_v51 = vor.u32 %v1901_v48, %v1594_v47  ;;  %v1523_v13 = vor.u32 %v1884_v7, %v1522_v5  ;;  %v1963_v5 = vld [vmem:[#allocation8 + $0xe8] sm:$0xff]  ;;  %v1937_v7 = vld [vmem:[#allocation8 + $0x18] sm:$0xff] }
  0xb7   : > { %v2468_v39 = vsub.f32 %v296_v1, %v309_v38  ;;  %v1570_v1 = vld [vmem:[#allocation7 + $0xc0] sm:$0xf]  ;;  %v1519_v38 = vor.u32 %v1879_v36, %v1516_v37  ;;  %811 = vmatpush.bf16.msrb.mxu1 %v1719_v57  ;;  %v1627_v37 = vor.u32 %v1909_v33, %v1626_v31  ;;  %v1892_v57 = vld [vmem:[#allocation7 + $0xac] sm:$0xf0] }
  0xb8   : > { %v1571_v4 = vor.u32 %v1898_v2, %v1570_v1  ;;  %v1727_v1 = vor.u32 %v1929_v60, %v1724_v62  ;;  %v1683_v2 = vor.u32 %v1924_v0, %v1682_v63  ;;  %v1555_v60 = vor.u32 %v1892_v57, %v1554_v54  ;;  %v1562_v62 = vld [vmem:[#allocation7 + $0x98] sm:$0xf]  ;;  %v1889_v0 = vld [vmem:[#allocation7 + $0x9c] sm:$0xf] }
  0xb9   : > { %v313_v40 = vmul.f32 %v2468_v39, %v2468_v39  ;;  %788 = vmatpush.bf16.msra.mxu3 %v1551_v24  ;;  %825 = vmatpush.bf16.msrb.mxu2 %v1723_v61  ;;  %v1663_v24 = vor.u32 %v1913_v21, %v1660_v22  ;;  %v1559_v61 = vor.u32 %v1888_v58, %v1556_v59  ;;  %v1893_v63 = vld [vmem:[#allocation7 + $0xb4] sm:$0xf0]  ;;  %v1492_v21 = vld [vmem:[#allocation7 + $0x30] sm:$0xf0]  ;;  %v1939_v58 = vld [vmem:[#allocation8 + $0x28] sm:$0xff] }
  0xba   : > { %745 = vmatpush.bf16.msra.mxu0 %v1571_v4  ;;  %v1684_v4 = vld [vmem:[#allocation7 + $0x1b0] sm:$0xf0]  ;;  %v1949_v54 = vld [vmem:[#allocation8 + $0x78] sm:$0xff]  ;;  %v1947_v59 = vld [vmem:[#allocation8 + $0x68] sm:$0xff] }
  0xbb   : > { %316 = vadd.xlane.f32.xlu1 %v313_v40  ;;  %v1474_v40 = vld [vmem:[#allocation7] sm:$0xf]  ;;  %v1687_v6 = vor.u32 %v1920_v3, %v1684_v4  ;;  %v1563_v3 = vor.u32 %v1893_v63, %v1562_v62  ;;  %v1564_v4 = vld [vmem:[#allocation7 + $0xb8] sm:$0xf0] }
  0xbc   : > { %v1475_v43 = vor.u32 %v1874_v41, %v1474_v40  ;;  %v1628_v40 = vld [vmem:[#allocation7 + $0x138] sm:$0xf0] }
  0xbd   : > { %789 = vmatpush.bf16.msra.mxu3 %v1519_v38  ;;  %812 = vmatpush.bf16.msrb.mxu1 %v1687_v6  ;;  %v1905_v38 = vld [vmem:[#allocation7 + $0x11c] sm:$0xf] }
  0xbe   : > { %746 = vmatpush.bf16.msra.mxu0 %v1539_v16  ;;  %v1652_v16 = vld [vmem:[#allocation7 + $0x170] sm:$0xf0]  ;;  %826 = vmatpush.bf16.msrb.mxu2 %v1691_v10  ;;  %v1631_v41 = vor.u32 %v1905_v38, %v1628_v40  ;;  %v1530_v10 = vld [vmem:[#allocation7 + $0x58] sm:$0xf]  ;;  %v1503_v38 = vor.u32 %v1873_v26, %v1500_v27  ;;  %v1935_v26 = vld [vmem:[#allocation8 + $0x8] sm:$0xff] }
  0xbf   : > { %v1655_v19 = vor.u32 %v1912_v14, %v1652_v16  ;;  %v1527_v14 = vor.u32 %v1880_v8, %v1524_v9  ;;  %v1532_v16 = vld [vmem:[#allocation7 + $0x78] sm:$0xf0]  ;;  %v1943_v27 = vld [vmem:[#allocation8 + $0x48] sm:$0xff] }
  0xc0   : > { %v1965_v57 = vld [vmem:[#allocation8 + $0xf8] sm:$0xff] }
  0xc1   : > { %790 = vmatpush.bf16.msra.mxu3 %v1487_v52  ;;  %813 = vmatpush.bf16.msrb.mxu1 %v1655_v19  ;;  %v1897_v52 = vld [vmem:[#allocation7 + $0xdc] sm:$0xf]  ;;  %v1876_v19 = vld [vmem:[#allocation7 + $0x2c] sm:$0xf0] }
  0xc2   : > { %747 = vmatpush.bf16.msra.mxu0 %v1507_v28  ;;  %v1904_v28 = vld [vmem:[#allocation7 + $0x114] sm:$0xf]  ;;  %827 = vmatpush.bf16.msrb.mxu2 %v1659_v20  ;;  %v1945_v8 = vld [vmem:[#allocation8 + $0x58] sm:$0xff] }
  0xc3   : > { %v1623_v36 = vor.u32 %v1904_v28, %v1620_v30  ;;  %v1872_v20 = vld [vmem:[#allocation7 + $0x14] sm:$0xf] }
  0xc4   : > { %v1495_v30 = vor.u32 %v1872_v20, %v1492_v21  ;;  %v1936_v21 = vld [vmem:[#allocation8 + $0x10] sm:$0xff] }
  0xc5   : > { %839 = vmatpush.bf16.msrb.mxu3 %v1727_v1  ;;  %814 = vmatpush.bf16.msrb.mxu1 %v1623_v36 }
  0xc6   : > { %748 = vmatpush.bf16.msra.mxu0 %v1475_v43  ;;  %v1900_v43 = vld [vmem:[#allocation7 + $0xec] sm:$0xf0]  ;;  %828 = vmatpush.bf16.msrb.mxu2 %v1627_v37 }
  0xc7   : > { %v1587_v45 = vor.u32 %v1900_v43, %v1586_v42 }
  0xc9   : > { %840 = vmatpush.bf16.msrb.mxu3 %v1695_v11  ;;  %815 = vmatpush.bf16.msrb.mxu1 %v1591_v50  ;;  %v1885_v11 = vld [vmem:[#allocation7 + $0x74] sm:$0xf0] }
  0xca   : > { %797 = vmatpush.bf16.msrb.mxu0 %v1715_v56  ;;  %v1599_v56 = vor.u32 %v1897_v52, %v1596_v53  ;;  %829 = vmatpush.bf16.msrb.mxu2 %v1595_v51  ;;  %v1531_v18 = vor.u32 %v1885_v11, %v1530_v10 }
  0xcd   : > { %841 = vmatpush.bf16.msrb.mxu3 %v1663_v24  ;;  %816 = vmatpush.bf16.msrb.mxu1 %v1559_v61  ;;  %v1498_v24 = vld [vmem:[#allocation7 + $0x18] sm:$0xf] }
  0xce   : > { %798 = vmatpush.bf16.msrb.mxu0 %v1683_v2  ;;  %830 = vmatpush.bf16.msrb.mxu2 %v1563_v3  ;;  %v1946_v3 = vld [vmem:[#allocation8 + $0x60] sm:$0xff] }
  0xd1   : > { %842 = vmatpush.bf16.msrb.mxu3 %v1631_v41  ;;  %817 = vmatpush.bf16.msrb.mxu1 %v1527_v14  ;;  %v1954_v14 = vld [vmem:[#allocation8 + $0xa0] sm:$0xff] }
  0xd2   : > { %799 = vmatpush.bf16.msrb.mxu0 %v1651_v15  ;;  %v1881_v15 = vld [vmem:[#allocation7 + $0x5c] sm:$0xf]  ;;  %831 = vmatpush.bf16.msrb.mxu2 %v1531_v18 }
  0xd5   : > { %843 = vmatpush.bf16.msrb.mxu3 %v1599_v56  ;;  %818 = vmatpush.bf16.msrb.mxu1 %v1495_v30  ;;  %v1948_v56 = vld [vmem:[#allocation8 + $0x70] sm:$0xff] }
  0xd6   : > { %800 = vmatpush.bf16.msrb.mxu0 %v1619_v29  ;;  %v1491_v29 = vor.u32 %v1876_v19, %v1490_v17 }
  0xda   : > { %801 = vmatpush.bf16.msrb.mxu0 %v1587_v45 }
  0xde   : > { %802 = vmatpush.bf16.msrb.mxu0 %v1555_v60 }
  0xe2   : > { %803 = vmatpush.bf16.msrb.mxu0 %v1523_v13 }
  0xe6   : > { %804 = vmatpush.bf16.msrb.mxu0 %v1491_v29 }
 0x126   : > { %v315_v23 = vpop.xlane.xlu1 %314 }
 0x127   : > { %v318_v25 = vmul.f32 %v315_v23, %v2460_v32  ;;  %v1535_v23 = vor.u32 %v1881_v15, %v1532_v16  ;;  %v1962_v15 = vld [vmem:[#allocation8 + $0xe0] sm:$0xff] }
 0x129   : > { %v2473_v34 = vadd.f32 1e-05, %v318_v25  ;;  %v1877_v25 = vld [vmem:[#allocation7 + $0x34] sm:$0xf0] }
 0x12a   : > { %v1499_v33 = vor.u32 %v1877_v25, %v1498_v24  ;;  %v1961_v24 = vld [vmem:[#allocation8 + $0xd8] sm:$0xff] }
 0x12b   : > { %2057 = vrsqrt.f32 %v2473_v34  ;;  %vm328_vm2 = vweird.f32 %v2473_v34 }
 0x12c   : > { %832 = vmatpush.bf16.msrb.mxu2 %v1499_v33  ;;  %v1952_v33 = vld [vmem:[#allocation8 + $0x90] sm:$0xff] }
 0x12e   : > { %v317_v49 = vpop.xlane.xlu1 %316 }
 0x12f   : > { %v319_v55 = vmul.f32 %v317_v49, %v2460_v32  ;;  %v1567_v32 = vor.u32 %v1889_v0, %v1564_v4  ;;  %v1956_v0 = vld [vmem:[#allocation8 + $0xb0] sm:$0xff]  ;;  %v1955_v4 = vld [vmem:[#allocation8 + $0xa8] sm:$0xff] }
 0x131   : > { %v2058_v1 = vpop.eup %2057  ;;  %v321_v2 = vadd.f32 1e-05, %v319_v55  ;;  %844 = vmatpush.bf16.msrb.mxu3 %v1567_v32  ;;  %v1940_v55 = vld [vmem:[#allocation8 + $0x30] sm:$0xff] }
 0x132   : > { %v323_v6 = vmul.f32 %v2058_v1, %v2473_v34  ;;  %vm329_vm1 = vweird.f32 %v2058_v1  ;;  %v2054_v34 = vld [vmem:[%s2714_s2] ss:$0 sm:$0xff] }
 0x133   : > { %2059 = vrsqrt.f32 %v321_v2  ;;  %vm330_vm3 = vmor %vm328_vm2, %vm329_vm1  ;;  %vm338_vm5 = vweird.f32 %v321_v2 }
 0x134   : > { %v324_v12 = vmul.f32 %v2058_v1, %v323_v6 }
 0x135   : > { %845 = vmatpush.bf16.msrb.mxu3 %v1535_v23  ;;  %v1953_v23 = vld [vmem:[#allocation8 + $0x98] sm:$0xff] }
 0x136   : > { %v325_v22 = vmul.f32 0.5, %v324_v12 }
 0x138   : > { %v326_v28 = vsub.f32 1.5, %v325_v22  ;;  %v1944_v22 = vld [vmem:[#allocation8 + $0x50] sm:$0xff] }
 0x139   : > { %v2060_v31 = vpop.eup %2059  ;;  %846 = vmatpush.bf16.msrb.mxu3 %v1503_v38 }
 0x13a   : > { %v327_v36 = vmul.f32 %v2058_v1, %v326_v28  ;;  %v333_v37 = vmul.f32 %v2060_v31, %v321_v2  ;;  %vm339_vm4 = vweird.f32 %v2060_v31  ;;  %v1938_v2 = vld [vmem:[#allocation8 + $0x20] sm:$0xff] }
 0x13b   : > { %vm340_vm6 = vmor %vm338_vm5, %vm339_vm4 }
 0x13c   : > { %v334_v40 = vmul.f32 %v2060_v31, %v333_v37  ;;  %v331_v41 = vsel %vm330_vm3, %v2058_v1, %v327_v36  ;;  %v1964_v1 = vld [vmem:[#allocation8 + $0xf0] sm:$0xff] }
 0x13d   : > { %v342_v45 = vmul.f32 %v331_v41, %v2463_v35  ;;  %v1941_v35 = vld [vmem:[#allocation8 + $0x38] sm:$0xff]  ;;  %v1960_v36 = vld [vmem:[#allocation8 + $0xd0] sm:$0xff] }
 0x13e   : > { %v335_v42 = vmul.f32 0.5, %v334_v40 }
 0x13f   : > { %v348_v48 = vmul.f32 %v2053_v44, %v342_v45 }
 0x140   : > { %v336_v43 = vsub.f32 1.5, %v335_v42 }
 0x141   : > { %v354_v51 = vadd.f32 %v2054_v34, %v348_v48 }
 0x142   : > { %v337_v46 = vmul.f32 %v2060_v31, %v336_v43  ;;  %v1934_v43 = vld [vmem:[#allocation8] sm:$0xff] }
 0x144   : > { %v341_v47 = vsel %vm340_vm6, %v2060_v31, %v337_v46 }
 0x145   : > { %v343_v49 = vmul.f32 %v341_v47, %v2468_v39  ;;  %v1957_v39 = vld [vmem:[#allocation8 + $0xb8] sm:$0xff] }
 0x147   : > { %v349_v50 = vmul.f32 %v2053_v44, %v343_v49  ;;  %v1942_v44 = vld [vmem:[#allocation8 + $0x40] sm:$0xff]  ;;  %v1951_v49 = vld [vmem:[#allocation8 + $0x88] sm:$0xff] }
 0x149   : > { %v355_v52 = vadd.f32 %v2054_v34, %v349_v50  ;;  %v1959_v50 = vld [vmem:[#allocation8 + $0xc8] sm:$0xff] }
 0x14b   : > { %v356_v53 = vpack.c.bf16 %v355_v52, %v354_v51 }
 0x14d   : > { %749 = vmatmul.bf16.vlgmr.msra.gmra.mxu0 %v356_v53  ;;  %763 = vmatmul.bf16.vlgmr.msra.gmra.mxu1 %v356_v53 }
 0x14e   : > { %777 = vmatmul.bf16.vlgmr.msra.gmra.mxu2 %v356_v53  ;;  %791 = vmatmul.bf16.vlgmr.msra.gmra.mxu3 %v356_v53 }
 0x14f   : > { %1281 = vmatpush.bf16.msra.mxu0 %v1941_v35  ;;  %1295 = vmatpush.bf16.msra.mxu1 %v1949_v54 }
 0x150   : > { %1309 = vmatpush.bf16.msra.mxu2 %v1957_v39  ;;  %1323 = vmatpush.bf16.msra.mxu3 %v1965_v57 }
 0x153   : > { %1282 = vmatpush.bf16.msra.mxu0 %v1940_v55  ;;  %1296 = vmatpush.bf16.msra.mxu1 %v1948_v56 }
 0x154   : > { %1310 = vmatpush.bf16.msra.mxu2 %v1956_v0  ;;  %1324 = vmatpush.bf16.msra.mxu3 %v1964_v1 }
 0x157   : > { %1283 = vmatpush.bf16.msra.mxu0 %v1939_v58  ;;  %1297 = vmatpush.bf16.msra.mxu1 %v1947_v59  ;;  %v1950_v58 = vld [vmem:[#allocation8 + $0x80] sm:$0xff] }
 0x158   : > { %1311 = vmatpush.bf16.msra.mxu2 %v1955_v4  ;;  %1325 = vmatpush.bf16.msra.mxu3 %v1963_v5  ;;  %v1958_v59 = vld [vmem:[#allocation8 + $0xc0] sm:$0xff] }
 0x15b   : > { %1284 = vmatpush.bf16.msra.mxu0 %v1938_v2  ;;  %1298 = vmatpush.bf16.msra.mxu1 %v1946_v3 }
 0x15c   : > { %1312 = vmatpush.bf16.msra.mxu2 %v1954_v14  ;;  %1326 = vmatpush.bf16.msra.mxu3 %v1962_v15 }
 0x15d   : > { %805 = vmatmul.bf16.vlgmr.msrb.gmra.mxu0 %v356_v53  ;;  %819 = vmatmul.bf16.vlgmr.msrb.gmra.mxu1 %v356_v53 }
 0x15e   : > { %833 = vmatmul.bf16.vlgmr.msrb.gmra.mxu2 %v356_v53  ;;  %847 = vmatmul.bf16.vlgmr.msrb.gmra.mxu3 %v356_v53 }
 0x15f   : > { %1285 = vmatpush.bf16.msra.mxu0 %v1937_v7  ;;  %1299 = vmatpush.bf16.msra.mxu1 %v1945_v8 }
 0x160   : > { %1313 = vmatpush.bf16.msra.mxu2 %v1953_v23  ;;  %1327 = vmatpush.bf16.msra.mxu3 %v1961_v24 }
 0x163   : > { %1286 = vmatpush.bf16.msra.mxu0 %v1936_v21  ;;  %1300 = vmatpush.bf16.msra.mxu1 %v1944_v22 }
 0x164   : > { %1314 = vmatpush.bf16.msra.mxu2 %v1952_v33  ;;  %1328 = vmatpush.bf16.msra.mxu3 %v1960_v36 }
 0x167   : > { %1287 = vmatpush.bf16.msra.mxu0 %v1935_v26  ;;  %1301 = vmatpush.bf16.msra.mxu1 %v1943_v27 }
 0x168   : > { %1315 = vmatpush.bf16.msra.mxu2 %v1951_v49  ;;  %1329 = vmatpush.bf16.msra.mxu3 %v1959_v50 }
 0x16b   : > { %1288 = vmatpush.bf16.msra.mxu0 %v1934_v43  ;;  %1302 = vmatpush.bf16.msra.mxu1 %v1942_v44 }
 0x16c   : > { %1316 = vmatpush.bf16.msra.mxu2 %v1950_v58  ;;  %1330 = vmatpush.bf16.msra.mxu3 %v1958_v59 }
 0x1ca   : > { %v2484_v60 = vpop.f32.mrf.mxu0  ;;  %v2486_v61 = vpop.f32.mrf.mxu1 }
 0x1cb   : > { %v1728_v62 = vmul.f32 -1.442695, %v2484_v60  ;;  %v1729_v63 = vmul.f32 -1.442695, %v2486_v61 }
 0x1cd   : > { %2061 = vpow2.f32 %v1728_v62 }
 0x1ce   : > { %2063 = vpow2.f32 %v1729_v63 }
 0x1d1   : > { %v2490_v6 = vpop.f32.mrf.mxu2  ;;  %v2492_v32 = vpop.f32.mrf.mxu3 }
 0x1d2   : > { %v1730_v9 = vmul.f32 -1.442695, %v2490_v6  ;;  %v1731_v10 = vmul.f32 -1.442695, %v2492_v32  ;;  %v2496_v11 = vpop.f32.mrf.mxu0  ;;  %v2498_v12 = vpop.f32.mrf.mxu1 }
 0x1d3   : > { %v2062_v13 = vpop.eup %2061  ;;  %v1732_v18 = vmul.f32 -1.442695, %v2496_v11  ;;  %v1733_v20 = vmul.f32 -1.442695, %v2498_v12 }
 0x1d4   : > { %v2064_v16 = vpop.eup %2063  ;;  %v2500_v17 = vadd.f32 1.0, %v2062_v13  ;;  %2065 = vpow2.f32 %v1730_v9 }
 0x1d5   : > { %v2503_v19 = vadd.f32 1.0, %v2064_v16  ;;  %2067 = vpow2.f32 %v1731_v10 }
 0x1d6   : > { %2069 = vrcp.f32 %v2500_v17  ;;  %v894_v54 = vand.u32 2147483647, %v2500_v17  ;;  %vm890_vm7 = vweird.f32 %v2500_v17  ;;  %v896_v39 = vand.u32 2147483648, %v2500_v17 }
 0x1d7   : > { %2071 = vrcp.f32 %v2503_v19  ;;  %v909_v57 = vand.u32 2147483647, %v2503_v19  ;;  %v911_v62 = vand.u32 2147483648, %v2503_v19  ;;  %vm905_vm11 = vweird.f32 %v2503_v19 }
 0x1d8   : > { %2073 = vpow2.f32 %v1732_v18  ;;  %vm2556_vm10 = vcmp.eq.f32.partialorder %v894_v54, 8.507059e+37  ;;  %v897_v13 = vor.u32 1.1754944e-38, %v896_v39 }
 0x1d9   : > { %2075 = vpow2.f32 %v1733_v20  ;;  %v2508_v25 = vpop.f32.mrf.mxu2  ;;  %v2512_v31 = vpop.f32.mrf.mxu3  ;;  %vm2561_vm12 = vcmp.eq.f32.partialorder %v909_v57, 8.507059e+37  ;;  %v912_v18 = vor.u32 1.1754944e-38, %v911_v62 }
 0x1da   : > { %v2066_v28 = vpop.eup %2065  ;;  %v1734_v40 = vmul.f32 -1.442695, %v2508_v25  ;;  %v1735_v47 = vmul.f32 -1.442695, %v2512_v31  ;;  %v820_v49 = vpop.f32.mrf.mxu1 }
 0x1db   : > { %v2068_v29 = vpop.eup %2067  ;;  %v2510_v30 = vadd.f32 1.0, %v2066_v28 }
 0x1dc   : > { %v2514_v37 = vpop.eup %2069  ;;  %v2516_v38 = vadd.f32 1.0, %v2068_v29 }
 0x1dd   : > { %v2519_v41 = vpop.eup %2071  ;;  %v886_v42 = vmul.f32 %v2514_v37, %v2500_v17  ;;  %2077 = vrcp.f32 %v2510_v30  ;;  %vm891_vm8 = vweird.f32 %v2514_v37  ;;  %v924_v1 = vand.u32 2147483647, %v2510_v30 }
 0x1de   : > { %v2074_v45 = vpop.eup %2073  ;;  %v901_v46 = vmul.f32 %v2519_v41, %v2503_v19  ;;  %2079 = vrcp.f32 %v2516_v38  ;;  %vm906_vm9 = vweird.f32 %v2519_v41  ;;  %v926_v2 = vand.u32 2147483648, %v2510_v30  ;;  %vm2569_vm13 = vmor %vm890_vm7, %vm891_vm8 }
 0x1df   : > { %v2076_v34 = vpop.eup %2075  ;;  %v887_v48 = vsub.f32 1.0, %v886_v42  ;;  %2081 = vpow2.f32 %v1734_v40  ;;  %v2528_v52 = vadd.f32 1.0, %v2074_v45  ;;  %v941_v3 = vand.u32 2147483648, %v2516_v38  ;;  %vm2577_vm15 = vmor %vm905_vm11, %vm906_vm9  ;;  %v806_v45 = vpop.f32.mrf.mxu0 }
 0x1e0   : > { %v902_v51 = vsub.f32 1.0, %v901_v46  ;;  %v2530_v53 = vadd.f32 1.0, %v2076_v34  ;;  %2083 = vpow2.f32 %v1735_v47  ;;  %vm920_vm14 = vweird.f32 %v2510_v30 }
 0x1e1   : > { %v888_v35 = vmul.f32 %v2514_v37, %v887_v48  ;;  %2085 = vrcp.f32 %v2528_v52  ;;  %v927_v23 = vor.u32 1.1754944e-38, %v926_v2  ;;  %vm935_vm0 = vweird.f32 %v2516_v38 }
 0x1e2   : > { %v903_v55 = vmul.f32 %v2519_v41, %v902_v51  ;;  %2087 = vrcp.f32 %v2530_v53  ;;  %v939_v17 = vand.u32 2147483647, %v2516_v38  ;;  %v954_v24 = vand.u32 2147483647, %v2528_v52 }
 0x1e3   : > { %v2535_v56 = vpop.eup %2077  ;;  %v889_v5 = vadd.f32 %v2514_v37, %v888_v35  ;;  %vm2592_vm1 = vcmp.eq.f32.partialorder %v924_v1, 8.507059e+37  ;;  %v2596_v33 = vor.u32 1.1754944e-38, %v941_v3  ;;  %vm950_vm3 = vweird.f32 %v2528_v52 }
 0x1e4   : > { %v916_v63 = vmul.f32 %v2535_v56, %v2510_v30  ;;  %v2546_v0 = vpop.eup %2079  ;;  %v904_v7 = vadd.f32 %v2519_v41, %v903_v55  ;;  %vm921_vm2 = vweird.f32 %v2535_v56  ;;  %vm2611_vm4 = vcmp.eq.f32.partialorder %v954_v24, 8.507059e+37  ;;  %v822_v24 = vpop.f32.mrf.mxu1 }
 0x1e5   : > { %v2082_v4 = vpop.eup %2081  ;;  %v931_v9 = vmul.f32 %v2546_v0, %v2516_v38  ;;  %v893_v27 = vsel %vm2569_vm13, %v2514_v37, %v889_v5  ;;  %v956_v48 = vand.u32 2147483648, %v2528_v52  ;;  %vm2618_vm5 = vmor %vm920_vm14, %vm921_vm2  ;;  %vm2622_vm6 = vcmp.eq.f32.partialorder %v939_v17, 8.507059e+37  ;;  %v834_v38 = vpop.f32.mrf.mxu2 }
 0x1e6   : > { %v917_v8 = vsub.f32 1.0, %v916_v63  ;;  %v2084_v15 = vpop.eup %2083  ;;  %v2584_v26 = vadd.f32 1.0, %v2082_v4  ;;  %v908_v28 = vsel %vm2577_vm15, %v2519_v41, %v904_v7  ;;  %v898_v46 = vsel %vm2556_vm10, %v897_v13, %v893_v27 }
 0x1e7   : > { %v932_v21 = vsub.f32 1.0, %v931_v9  ;;  %v2086_v19 = vpop.eup %2085  ;;  %v2602_v37 = vadd.f32 1.0, %v2084_v15  ;;  %v913_v47 = vsel %vm2561_vm12, %v912_v18, %v908_v28  ;;  %v969_v55 = vand.u32 2147483647, %v2530_v53 }
 0x1e8   : > { %v918_v20 = vmul.f32 %v2535_v56, %v917_v8  ;;  %v946_v36 = vmul.f32 %v2086_v19, %v2528_v52  ;;  %v2088_v40 = vpop.eup %2087  ;;  %2089 = vrcp.f32 %v2584_v26  ;;  %vm951_vm7 = vweird.f32 %v2086_v19 }
 0x1e9   : > { %v933_v43 = vmul.f32 %v2546_v0, %v932_v21  ;;  %v961_v44 = vmul.f32 %v2088_v40, %v2530_v53  ;;  %vm936_vm8 = vweird.f32 %v2546_v0  ;;  %v971_v30 = vand.u32 2147483648, %v2530_v53  ;;  %vm952_vm10 = vmor %vm950_vm3, %vm951_vm7 }
 0x1ea   : > { %v919_v42 = vadd.f32 %v2535_v56, %v918_v20  ;;  %v947_v41 = vsub.f32 1.0, %v946_v36  ;;  %2091 = vrcp.f32 %v2602_v37  ;;  %vm966_vm9 = vweird.f32 %v2088_v40  ;;  %vm2641_vm12 = vmor %vm935_vm0, %vm936_vm8 }
 0x1eb   : > { %v962_v54 = vsub.f32 1.0, %v961_v44  ;;  %v934_v57 = vadd.f32 %v2546_v0, %v933_v43  ;;  %v1005_v63 = vmul.f32 %v898_v46, %v2484_v60  ;;  %v1006_v1 = vmul.f32 %v913_v47, %v2486_v61 }
 0x1ec   : > { %v948_v35 = vmul.f32 %v2086_v19, %v947_v41  ;;  %v923_v39 = vsel %vm2618_vm5, %v2535_v56, %v919_v42  ;;  %v957_v56 = vor.u32 1.1754944e-38, %v956_v48  ;;  %vm965_vm11 = vweird.f32 %v2530_v53 }
 0x1ed   : > { %v963_v59 = vmul.f32 %v2088_v40, %v962_v54  ;;  %vm970_vm13 = vcmp.eq.f32.partialorder %v969_v55, 8.507059e+37  ;;  %v928_v60 = vsel %vm2592_vm1, %v927_v23, %v923_v39  ;;  %vm967_vm14 = vmor %vm965_vm11, %vm966_vm9  ;;  %v972_v52 = vor.u32 1.1754944e-38, %v971_v30  ;;  %v848_v23 = vpop.f32.mrf.mxu3  ;;  %v836_v34 = vpop.f32.mrf.mxu2 }
 0x1ee   : > { %v949_v58 = vadd.f32 %v2086_v19, %v948_v35  ;;  %v2090_v62 = vpop.eup %2089  ;;  %v984_v53 = vand.u32 2147483647, %v2584_v26  ;;  %v938_v7 = vsel %vm2641_vm12, %v2546_v0, %v934_v57  ;;  %vm980_vm15 = vweird.f32 %v2584_v26 }
 0x1ef   : > { %v964_v4 = vadd.f32 %v2088_v40, %v963_v59  ;;  %v976_v5 = vmul.f32 %v2090_v62, %v2584_v26  ;;  %v986_v15 = vand.u32 2147483648, %v2584_v26  ;;  %v1013_v16 = vmul.f32 %v1005_v63, %v806_v45 }
 0x1f0   : > { %v953_v3 = vsel %vm952_vm10, %v2086_v19, %v949_v58  ;;  %v2092_v13 = vpop.eup %2091  ;;  %vm981_vm0 = vweird.f32 %v2090_v62  ;;  %v808_v19 = vpop.f32.mrf.mxu0  ;;  %v1007_v0 = vmul.f32 %v928_v60, %v2490_v6  ;;  %vm2663_vm1 = vcmp.eq.f32.partialorder %v984_v53, 8.507059e+37 }
 0x1f1   : > { %v958_v61 = vsel %vm2611_vm4, %v957_v56, %v953_v3  ;;  %v968_v9 = vsel %vm967_vm14, %v2088_v40, %v964_v4  ;;  %v977_v10 = vsub.f32 1.0, %v976_v5  ;;  %v991_v21 = vmul.f32 %v2092_v13, %v2602_v37  ;;  %vm982_vm2 = vmor %vm980_vm15, %vm981_vm0 }
 0x1f2   : > { %v1009_v8 = vmul.f32 %v958_v61, %v2496_v11  ;;  %v973_v14 = vsel %vm970_vm13, %v972_v52, %v968_v9  ;;  %v943_v11 = vsel %vm2622_vm6, %v2596_v33, %v938_v7  ;;  %v1014_v28 = vmul.f32 %v1006_v1, %v820_v49 }
 0x1f3   : > { %v1010_v18 = vmul.f32 %v973_v14, %v2498_v12  ;;  %v978_v20 = vmul.f32 %v2090_v62, %v977_v10  ;;  %v992_v12 = vsub.f32 1.0, %v991_v21  ;;  %v987_v36 = vor.u32 1.1754944e-38, %v986_v15 }
 0x1f4   : > { %v1017_v17 = vmul.f32 %v1009_v8, %v808_v19  ;;  %v999_v6 = vand.u32 2147483647, %v2602_v37  ;;  %v1001_v40 = vand.u32 2147483648, %v2602_v37  ;;  %vm996_vm3 = vweird.f32 %v2092_v13 }
 0x1f5   : > { %v979_v27 = vadd.f32 %v2090_v62, %v978_v20  ;;  %v1018_v29 = vmul.f32 %v1010_v18, %v822_v24  ;;  %v993_v43 = vmul.f32 %v2092_v13, %v992_v12  ;;  %vm995_vm4 = vweird.f32 %v2602_v37  ;;  %v850_v55 = vpop.f32.mrf.mxu3 }
 0x1f6   : > { %v1021_v33 = vpack.c.bf16 %v1017_v17, %v1013_v16  ;;  %v1008_v26 = vmul.f32 %v943_v11, %v2492_v32  ;;  %vm997_vm5 = vmor %vm995_vm4, %vm996_vm3  ;;  %v1002_v47 = vor.u32 1.1754944e-38, %v1001_v40  ;;  %vm1000_vm6 = vcmp.eq.f32.partialorder %v999_v6, 8.507059e+37 }
 0x1f7   : > { %v983_v42 = vsel %vm982_vm2, %v2090_v62, %v979_v27  ;;  %v1022_v41 = vpack.c.bf16 %v1018_v29, %v1014_v28  ;;  %v994_v46 = vadd.f32 %v2092_v13, %v993_v43  ;;  %v1015_v49 = vmul.f32 %v1007_v0, %v834_v38 }
 0x1f8   : > { %v988_v44 = vsel %vm2663_vm1, %v987_v36, %v983_v42  ;;  %1289 = vmatmul.bf16.vlgmr.msra.gmra.mxu0 %v1021_v33 }
 0x1f9   : > { %v1011_v45 = vmul.f32 %v988_v44, %v2508_v25  ;;  %1303 = vmatmul.bf16.vlgmr.msra.gmra.mxu1 %v1022_v41  ;;  %v998_v48 = vsel %vm997_vm5, %v2092_v13, %v994_v46  ;;  %v1016_v25 = vmul.f32 %v1008_v26, %v848_v23 }
 0x1fa   : > { %v1003_v51 = vsel %vm1000_vm6, %v1002_v47, %v998_v48 }
 0x1fb   : > { %v1019_v50 = vmul.f32 %v1011_v45, %v836_v34  ;;  %v1012_v35 = vmul.f32 %v1003_v51, %v2512_v31 }
 0x1fd   : > { %v1023_v54 = vpack.c.bf16 %v1019_v50, %v1015_v49  ;;  %v1020_v39 = vmul.f32 %v1012_v35, %v850_v55 }
 0x1ff   : > { %1317 = vmatmul.bf16.vlgmr.msra.gmra.mxu2 %v1023_v54  ;;  %v1024_v37 = vpack.c.bf16 %v1020_v39, %v1016_v25 }
 0x201   : > { %1331 = vmatmul.bf16.vlgmr.msra.gmra.mxu3 %v1024_v37 }
 0x275   : > { %v1290_v32 = vpop.f32.mrf.mxu0 }
 0x276   : > { %v1304_v30 = vpop.f32.mrf.mxu1 }
 0x277   : > { %v1305_v57 = vadd.f32 %v1304_v30, %v1290_v32 }
 0x27d   : > { %v1292_v62 = vpop.f32.mrf.mxu0 }
 0x27e   : > { %v1306_v63 = vpop.f32.mrf.mxu1 }
 0x27f   : > { %v1307_v56 = vadd.f32 %v1306_v63, %v1292_v62 }
 0x282   : > { %v1318_v58 = vpop.f32.mrf.mxu2 }
 0x283   : > { %v1319_v59 = vadd.f32 %v1318_v58, %v1305_v57 }
 0x284   : > { %v1332_v1 = vpop.f32.mrf.mxu3 }
 0x285   : > { %v1333_v31 = vadd.f32 %v1332_v1, %v1319_v59 }
 0x287   : > { %1337 = vst [vmem:[%s292_s23] sm:$0xff] %v1333_v31 }
 0x28a   : > { %v1320_v2 = vpop.f32.mrf.mxu2 }
 0x28b   : > { %v1321_v3 = vadd.f32 %v1320_v2, %v1307_v56 }
 0x28c   : > { %v1334_v4 = vpop.f32.mrf.mxu3 }
 0x28d   : > { %v1335_v5 = vadd.f32 %v1334_v4, %v1321_v3 }
 0x28f   : > { %1338 = vst [vmem:[%s292_s23 + $0x8] sm:$0xff] %v1335_v5 }
 0x290   : > { %2240 = shalt.err (!%p2237_p11)
}
 0x291   : > { %s2299_s17 = smov 128   ;;  %s2300_s29 = smov 8  }
 0x292   : > { %1981 = dma.vmem_to_hbm [thread:$0]  (%p2414_p7), %s1353_s12, 256, %s1355_s13, %s1340_s22, %s2299_s17, %s2299_s17, %s2300_s29  }
 0x293 PF: > { %s1369_s16 = sand.u32 1, %s2275_s18   ;;  %p2744_p12 = scmp.ge.s32.totalorder %s2287_s21, 2 }
 0x294   : > { %s1370_s23 = scalar_lea.sflag [#allocation4], %s1369_s16 }
 0x295   : > { %p1998_p13 = pnand %p2744_p12, %p2366_p6 }
 0x297   : > { %p1999_p0 = pneg %p1998_p13 }
 0x299   : > { %2270 = dma.done.wait (%p1999_p0), %s1370_s23, 256  }
 0x29a   : > { %2272 = vsyncadd (%p1999_p0), %s1370_s23, 4294967040  ;;  %p20_p3 = scmp.ge.s32.totalorder %s2400_s30, 4   ;;  %s2745_s18 = smov %s2279_s19 }
 0x29b   : > { %s2746_s19 = smov %s2283_s20  ;;  %s2747_s20 = smov %s2410_s8 }
 0x29c   : > { %s2748_s21 = smov %s2400_s30  ;;  %22 = sbr.rel (!%p20_p3) target bundleno = 7 (0x7), region = 97 }
 0x2a1   :  { %1376 = vsyncpa [#allocation3], 1 }
 0x2a2   :  { %1378 = vsyncpa [#allocation3 + $0x1], 1 }
 0x2a3   :  { %1379 = vsyncpa [#allocation6], 1 }
 0x2a4   :  { %1380 = vsyncpa [#allocation9], 1 }
 0x2a5   :  { %1381 = vsyncpa [#allocation4], 1 }
 0x2a6   :  { %1383 = vsyncpa [#allocation4 + $0x1], 1 }

</bundles_post_ra>
